<compile_context>
chip_gen: v7x
topology: tpu7x:2x2x1
jax: 0.10.0
libtpu: 0.0.40
codegen_flags: <defaults>
</compile_context>

<pallas_src>
import math
from functools import partial, lru_cache

import numpy as np
import jax
import jax.numpy as jnp
from jax.experimental import pallas as pl
from jax.experimental.pallas import tpu as pltpu


# MXU is bf16-native on v5e/v6e/v7x: matmul operands are bf16 (accumulation is
# f32 via preferred_element_type).  LayerNorm/softmax/residual math stays f32.
MATMUL_DTYPE = jnp.bfloat16

# Softmax denominator uses the EUP approximate reciprocal (free bundle slot).
# Set to False for exact division / closer parity with torch softmax.
SOFTMAX_APPROX_RECIP = True

_MASK_NEG = -1e30


# ------------------------------ small helpers -------------------------------

def _bytes(shape, dtype):
    return int(np.prod(shape)) * jnp.dtype(dtype).itemsize


def _vmem_limit(block_bytes):
    """Explicit scoped-VMEM limit: double-buffered blocks + headroom, clamped
    to a range safe on all of v5e / v6e / v7x."""
    return int(min(max(2.5 * block_bytes + (2 << 20), 16 << 20), 64 << 20))


def _row_tile(m, cap=512):
    """Row-tile size for row-independent kernels (linear / FFN rows)."""
    return m if m <= cap else cap


def _divisor_tile(n, cands):
    if n <= cands[0]:
        return n
    for c in cands:
        if n % c == 0:
            return c
    return n


def _seq_tile(s):
    """Query-row tile for attention (must divide Sq)."""
    return _divisor_tile(s, (256, 128, 64, 32, 16, 8))


def _f_tile(f):
    """FFN hidden-dim tile (must divide F exactly — reduction axis)."""
    return _divisor_tile(f, (1024, 512, 256, 128))


# ----------------------------- Pallas kernels ------------------------------

def _fused_mha_kernel(xq_ref, xkv_ref, wq_ref, bq_ref, wk_ref, bk_ref,
                      wv_ref, bv_ref, wo_ref, bo_ref, g_ref, beta_ref, o_ref,
                      *, num_heads, head_dim, scale, eps, causal, q_tile):
    """Fused post-norm attention sub-layer for one (batch, q-tile) grid step:
         LN(x_q + out_proj(MHA(x_q, x_kv, x_kv)))
       Q/K/V and out-proj are full-width (D x D) GEMMs; only softmax is
       per-head (lane slices of the fused projections)."""
    xq = xq_ref[0]      # (tq, D) f32
    xkv = xkv_ref[0]    # (Sk, D) f32

    # Cast activations to the MXU dtype once (hoisted out of the head loop).
    xq_c = xq.astype(MATMUL_DTYPE)
    xkv_c = xkv.astype(MATMUL_DTYPE)

    # Full-width Q/K/V projections — MXU N dimension = D (not Dh).
    q = jnp.dot(xq_c, wq_ref[...], preferred_element_type=jnp.float32) + bq_ref[...]
    k = jnp.dot(xkv_c, wk_ref[...], preferred_element_type=jnp.float32) + bk_ref[...]
    v = jnp.dot(xkv_c, wv_ref[...], preferred_element_type=jnp.float32) + bv_ref[...]
    qc = q.astype(MATMUL_DTYPE)
    kc = k.astype(MATMUL_DTYPE)
    vc = v.astype(MATMUL_DTYPE)

    tq = xq.shape[0]
    sk = xkv.shape[0]

    if causal:
        # Build the causal mask in-kernel (no (Sq,Sk) HBM table, no zero-adds
        # on the non-causal paths).
        q_off = pl.program_id(1) * q_tile
        q_ids = jax.lax.broadcasted_iota(jnp.int32, (tq, sk), 0) + q_off
        k_ids = jax.lax.broadcasted_iota(jnp.int32, (tq, sk), 1)
        neg_mask = jnp.where(k_ids > q_ids, _MASK_NEG, 0.0)

    heads = []
    for h in range(num_heads):                       # static unroll, H small
        sl = slice(h * head_dim, (h + 1) * head_dim)
        s = jax.lax.dot_general(qc[:, sl], kc[:, sl],
                                (((1,), (1,)), ((), ())),
                                preferred_element_type=jnp.float32) * scale
        if causal:
            s = s + neg_mask
        s = s - jnp.max(s, axis=-1, keepdims=True)
        p = jnp.exp(s)
        p = p * pl.reciprocal(jnp.sum(p, axis=-1, keepdims=True),
                              approx=SOFTMAX_APPROX_RECIP)
        heads.append(jnp.dot(p.astype(MATMUL_DTYPE), vc[:, sl],
                             preferred_element_type=jnp.float32))
    attn = jnp.concatenate(heads, axis=-1)           # (tq, D)

    # Full-width output projection + residual + post-LayerNorm.
    y = xq + jnp.dot(attn.astype(MATMUL_DTYPE), wo_ref[...],
                     preferred_element_type=jnp.float32) + bo_ref[...]
    mu = jnp.mean(y, axis=-1, keepdims=True)
    var = jnp.mean((y - mu) ** 2, axis=-1, keepdims=True)
    o_ref[0] = ((y - mu) * jax.lax.rsqrt(var + eps)) * g_ref[...] + beta_ref[...]


def _fused_ffn_kernel(x_ref, w1_ref, b1_ref, w2_ref, b2_ref, g_ref, beta_ref,
                      *rest, eps, fuse_final_ln):
    """Fused FFN sub-layer, F-tiled:  LN(x + W2 relu(W1 x + b1) + b2)
       (optionally followed by the stack-final LayerNorm, fused)."""
    if fuse_final_ln:
        fg_ref, fb_ref, o_ref, acc_ref = rest
    else:
        o_ref, acc_ref = rest

    j = pl.program_id(1)

    @pl.when(j == 0)
    def _():
        acc_ref[...] = jnp.zeros_like(acc_ref)

    x = x_ref[...]                                               # (tm, D) f32
    h = jnp.maximum(jnp.dot(x.astype(MATMUL_DTYPE), w1_ref[...],
                            preferred_element_type=jnp.float32) + b1_ref[...],
                    0.0)                                         # (tm, tf)
    acc_ref[...] += jnp.dot(h.astype(MATMUL_DTYPE), w2_ref[...],
                            preferred_element_type=jnp.float32)  # (tm, D)

    @pl.when(j == pl.num_programs(1) - 1)
    def _():
        y = x + acc_ref[...] + b2_ref[...]
        mu = jnp.mean(y, axis=-1, keepdims=True)
        var = jnp.mean((y - mu) ** 2, axis=-1, keepdims=True)
        y = ((y - mu) * jax.lax.rsqrt(var + eps)) * g_ref[...] + beta_ref[...]
        if fuse_final_ln:                                        # static flag
            mu2 = jnp.mean(y, axis=-1, keepdims=True)
            var2 = jnp.mean((y - mu2) ** 2, axis=-1, keepdims=True)
            y = ((y - mu2) * jax.lax.rsqrt(var2 + eps)) * fg_ref[...] + fb_ref[...]
        o_ref[...] = y


def _linear_kernel(x_ref, w_ref, b_ref, o_ref):
    o_ref[...] = jnp.dot(x_ref[...].astype(MATMUL_DTYPE), w_ref[...],
                         preferred_element_type=jnp.float32) + b_ref[...]


def _mse_kernel(a_ref, b_ref, o_ref, *, denom):
    i = pl.program_id(0)

    @pl.when(i == 0)
    def _():
        o_ref[...] = jnp.zeros_like(o_ref)

    d = a_ref[...] - b_ref[...]
    o_ref[...] += jnp.sum(d * d, keepdims=True)

    @pl.when(i == pl.num_programs(0) - 1)
    def _():
        o_ref[...] = o_ref[...] * (1.0 / denom)


# --------------------------- kernel wrappers --------------------------------

def fused_mha_block(x_q, x_kv, p, ln_g, ln_b, num_heads, *, causal, eps=1e-5):
    """x_q: (B, Sq, D), x_kv: (B, Sk, D) -> (B, Sq, D)."""
    B, Sq, D = x_q.shape
    Sk = x_kv.shape[1]
    H = num_heads
    Dh = D // H
    scale = 1.0 / math.sqrt(Dh)
    tq = _seq_tile(Sq)
    grid = (B, Sq // tq)

    blk = (2 * _bytes((1, tq, D), jnp.float32)        # x_q in + out
           + _bytes((1, Sk, D), jnp.float32)          # x_kv
           + 4 * _bytes((D, D), MATMUL_DTYPE)         # wq, wk, wv, wo
           + 6 * _bytes((1, D), jnp.float32)          # biases + LN params
           + 3 * _bytes((tq, Sk), jnp.float32))       # per-head score scratch

    return pl.pallas_call(
        partial(_fused_mha_kernel, num_heads=H, head_dim=Dh, scale=scale,
                eps=eps, causal=causal, q_tile=tq),
        out_shape=jax.ShapeDtypeStruct((B, Sq, D), jnp.float32),
        grid=grid,
        in_specs=[
            pl.BlockSpec((1, tq, D), lambda b, i: (b, i, 0)),   # x_q tile
            pl.BlockSpec((1, Sk, D), lambda b, i: (b, 0, 0)),   # x_kv
            pl.BlockSpec((D, D), lambda b, i: (0, 0)),          # wq (resident)
            pl.BlockSpec((1, D), lambda b, i: (0, 0)),          # bq
            pl.BlockSpec((D, D), lambda b, i: (0, 0)),          # wk
            pl.BlockSpec((1, D), lambda b, i: (0, 0)),          # bk
            pl.BlockSpec((D, D), lambda b, i: (0, 0)),          # wv
            pl.BlockSpec((1, D), lambda b, i: (0, 0)),          # bv
            pl.BlockSpec((D, D), lambda b, i: (0, 0)),          # wo
            pl.BlockSpec((1, D), lambda b, i: (0, 0)),          # bo
            pl.BlockSpec((1, D), lambda b, i: (0, 0)),          # LN gamma
            pl.BlockSpec((1, D), lambda b, i: (0, 0)),          # LN beta
        ],
        out_specs=pl.BlockSpec((1, tq, D), lambda b, i: (b, i, 0)),
        compiler_params=pltpu.CompilerParams(
            dimension_semantics=("parallel", "parallel"),
            vmem_limit_bytes=_vmem_limit(blk)),
    )(x_q, x_kv, p['wq'], p['bq'], p['wk'], p['bk'], p['wv'], p['bv'],
      p['wo'], p['bo'], ln_g, ln_b)


def fused_ffn_block(x, w1, b1, w2, b2, ln_g, ln_b,
                    final_g=None, final_b=None, eps=1e-5):
    """x: (B, S, D) -> (B, S, D).  Row-tiled over B*S, F-tiled reduction with a
       VMEM f32 accumulator; optionally fuses the stack-final LayerNorm."""
    B, S, D = x.shape
    M = B * S
    F = w1.shape[1]
    x2 = x.reshape(M, D)
    tm = _row_tile(M)
    tf = _f_tile(F)
    nf = F // tf
    fuse_final_ln = final_g is not None

    in_specs = [
        pl.BlockSpec((tm, D), lambda i, j: (i, 0)),   # x rows
        pl.BlockSpec((D, tf), lambda i, j: (0, j)),   # w1 F-tile
        pl.BlockSpec((1, tf), lambda i, j: (0, j)),   # b1 F-tile
        pl.BlockSpec((tf, D), lambda i, j: (j, 0)),   # w2 F-tile
        pl.BlockSpec((1, D), lambda i, j: (0, 0)),    # b2
        pl.BlockSpec((1, D), lambda i, j: (0, 0)),    # LN gamma
        pl.BlockSpec((1, D), lambda i, j: (0, 0)),    # LN beta
    ]
    args = [x2, w1, b1, w2, b2, ln_g, ln_b]
    if fuse_final_ln:
        in_specs += [pl.BlockSpec((1, D), lambda i, j: (0, 0)),
                     pl.BlockSpec((1, D), lambda i, j: (0, 0))]
        args += [final_g, final_b]

    blk = (3 * _bytes((tm, D), jnp.float32)           # x, out, acc
           + _bytes((D, tf), MATMUL_DTYPE) + _bytes((tf, D), MATMUL_DTYPE)
           + _bytes((tm, tf), jnp.float32)            # hidden activations
           + _bytes((1, tf), jnp.float32) + 5 * _bytes((1, D), jnp.float32))

    out = pl.pallas_call(
        partial(_fused_ffn_kernel, eps=eps, fuse_final_ln=fuse_final_ln),
        out_shape=jax.ShapeDtypeStruct((M, D), jnp.float32),
        grid=(pl.cdiv(M, tm), nf),
        in_specs=in_specs,
        out_specs=pl.BlockSpec((tm, D), lambda i, j: (i, 0)),
        scratch_shapes=[pltpu.VMEM((tm, D), jnp.float32)],
        compiler_params=pltpu.CompilerParams(
            dimension_semantics=("parallel", "arbitrary"),
            vmem_limit_bytes=_vmem_limit(blk)),
    )(*args)
    return out.reshape(B, S, D)


def linear(x2d, w, b):
    M, K = x2d.shape
    N = w.shape[1]
    tm = _row_tile(M)
    blk = (_bytes((tm, K), jnp.float32) + _bytes((K, N), MATMUL_DTYPE)
           + _bytes((1, N), jnp.float32) + _bytes((tm, N), jnp.float32))
    return pl.pallas_call(
        _linear_kernel,
        out_shape=jax.ShapeDtypeStruct((M, N), jnp.float32),
        grid=(pl.cdiv(M, tm),),
        in_specs=[pl.BlockSpec((tm, K), lambda i: (i, 0)),
                  pl.BlockSpec((K, N), lambda i: (0, 0)),
                  pl.BlockSpec((1, N), lambda i: (0, 0))],
        out_specs=pl.BlockSpec((tm, N), lambda i: (i, 0)),
        compiler_params=pltpu.CompilerParams(
            dimension_semantics=("parallel",),
            vmem_limit_bytes=_vmem_limit(blk)),
    )(x2d, w, b)


def mse_loss(a2d, b2d):
    M, D = a2d.shape
    tm = M
    if M > 512:
        for cand in (512, 256, 128, 64, 32, 16, 8):
            if M % cand == 0:
                tm = cand
                break
    blk = 2 * _bytes((tm, D), jnp.float32)
    out = pl.pallas_call(
        partial(_mse_kernel, denom=float(M * D)),
        out_shape=jax.ShapeDtypeStruct((1, 1), jnp.float32),
        grid=(M // tm,),
        in_specs=[pl.BlockSpec((tm, D), lambda i: (i, 0)),
                  pl.BlockSpec((tm, D), lambda i: (i, 0))],
        out_specs=pl.BlockSpec((1, 1), lambda i: (0, 0)),
        compiler_params=pltpu.CompilerParams(
            dimension_semantics=("arbitrary",),
            vmem_limit_bytes=_vmem_limit(blk)),
    )(a2d, b2d)
    return out[0, 0]


# ----------------------- cached tables (built once) -------------------------

@lru_cache(maxsize=None)
def _pe_table(n, d):
    """Sin/cos positional encoding table, shape (1, n, d)."""
    pos = np.arange(n, dtype=np.float32)[:, None]
    div = np.exp(np.arange(0, d, 2, dtype=np.float32) * (-math.log(10000.0) / d))
    ang = pos * div
    pe = np.zeros((n, d), np.float32)
    pe[:, 0::2] = np.sin(ang)
    pe[:, 1::2] = np.cos(ang)[:, : d // 2]   # robust to odd d
    return jnp.asarray(pe)[None]


def positional_encoding(x):
    B, N, D = x.shape
    return x + _pe_table(N, D)


# ----------------------------- model pieces --------------------------------

def encoder_layer(x, p, num_heads, final_g=None, final_b=None):
    x2 = fused_mha_block(x, x, p['sa'], p['ln1_g'], p['ln1_b'], num_heads,
                         causal=False)
    return fused_ffn_block(x2, p['w1'], p['b1'], p['w2'], p['b2'],
                           p['ln2_g'], p['ln2_b'], final_g, final_b)


def decoder_layer(x, mem, p, num_heads, final_g=None, final_b=None):
    x2 = fused_mha_block(x, x, p['sa'], p['ln1_g'], p['ln1_b'], num_heads,
                         causal=True)
    x3 = fused_mha_block(x2, mem, p['ca'], p['ln2_g'], p['ln2_b'], num_heads,
                         causal=False)
    return fused_ffn_block(x3, p['w1'], p['b1'], p['w2'], p['b2'],
                           p['ln3_g'], p['ln3_b'], final_g, final_b)


def encode(ctx, params, num_heads):
    mem = ctx
    n = len(params['enc_layers'])
    for li, lp in enumerate(params['enc_layers']):
        last = (li == n - 1)
        mem = encoder_layer(mem, lp, num_heads,
                            params['enc_norm_g'] if last else None,
                            params['enc_norm_b'] if last else None)
    return mem


def decode(tgt, mem, params, num_heads):
    x = tgt
    n = len(params['dec_layers'])
    for li, lp in enumerate(params['dec_layers']):
        last = (li == n - 1)
        x = decoder_layer(x, mem, lp, num_heads,
                          params['dec_norm_g'] if last else None,
                          params['dec_norm_b'] if last else None)
    return x


# ------------------------------ parameters ---------------------------------

def _xavier(key, shape, dtype=jnp.float32):
    fan_in, fan_out = shape
    a = math.sqrt(6.0 / (fan_in + fan_out))
    return jax.random.uniform(key, shape, jnp.float32, -a, a).astype(dtype)


def _init_mha(key, D, H):
    ks = jax.random.split(key, 4)
    wq, wk, wv, wo = (_xavier(k, (D, D), MATMUL_DTYPE) for k in ks)
    z = jnp.zeros((1, D), jnp.float32)
    return {'wq': wq, 'bq': z, 'wk': wk, 'bk': z,
            'wv': wv, 'bv': z, 'wo': wo, 'bo': z}


def _init_enc_layer(key, D, F, H):
    k1, k2, k3 = jax.random.split(key, 3)
    return {'sa': _init_mha(k1, D, H),
            'w1': _xavier(k2, (D, F), MATMUL_DTYPE), 'b1': jnp.zeros((1, F), jnp.float32),
            'w2': _xavier(k3, (F, D), MATMUL_DTYPE), 'b2': jnp.zeros((1, D), jnp.float32),
            'ln1_g': jnp.ones((1, D), jnp.float32), 'ln1_b': jnp.zeros((1, D), jnp.float32),
            'ln2_g': jnp.ones((1, D), jnp.float32), 'ln2_b': jnp.zeros((1, D), jnp.float32)}


def _init_dec_layer(key, D, F, H):
    k1, k2, k3, k4 = jax.random.split(key, 4)
    return {'sa': _init_mha(k1, D, H), 'ca': _init_mha(k2, D, H),
            'w1': _xavier(k3, (D, F), MATMUL_DTYPE), 'b1': jnp.zeros((1, F), jnp.float32),
            'w2': _xavier(k4, (F, D), MATMUL_DTYPE), 'b2': jnp.zeros((1, D), jnp.float32),
            'ln1_g': jnp.ones((1, D), jnp.float32), 'ln1_b': jnp.zeros((1, D), jnp.float32),
            'ln2_g': jnp.ones((1, D), jnp.float32), 'ln2_b': jnp.zeros((1, D), jnp.float32),
            'ln3_g': jnp.ones((1, D), jnp.float32), 'ln3_b': jnp.zeros((1, D), jnp.float32)}


class JEPPredictorPallas:
    """JAX/Pallas port of JEPPredictor.forward (eval-mode dropout = identity)."""

    def __init__(self, latent_dim, prediction_steps, patch_size,
                 num_layers=3, num_heads=16, ffn_dim=None, dropout=0.2,
                 key=jax.random.PRNGKey(0)):
        self.latent_dim = latent_dim
        self.patch_size = patch_size
        self.prediction_steps = prediction_steps
        self.pred_len = math.ceil(prediction_steps / patch_size)
        self.total_pred_steps = self.pred_len * patch_size
        self.num_heads = num_heads
        if ffn_dim is None:
            ffn_dim = latent_dim * 4
        # dropout is ignored (deterministic / eval-mode semantics)

        keys = jax.random.split(key, 2 * num_layers + 1)
        D, F, H = latent_dim, ffn_dim, num_heads
        self.params = {
            'enc_layers': [_init_enc_layer(keys[i], D, F, H) for i in range(num_layers)],
            'dec_layers': [_init_dec_layer(keys[num_layers + i], D, F, H)
                           for i in range(num_layers)],
            'enc_norm_g': jnp.ones((1, D), jnp.float32), 'enc_norm_b': jnp.zeros((1, D), jnp.float32),
            'dec_norm_g': jnp.ones((1, D), jnp.float32), 'dec_norm_b': jnp.zeros((1, D), jnp.float32),
            'proj_w': _xavier(keys[-1], (D, D), MATMUL_DTYPE),
            'proj_b': jnp.zeros((1, D), jnp.float32),
        }

    def __call__(self, ctx_latents, tgt_latents=None):
        B, N_ctx, D = ctx_latents.shape
        assert D == self.latent_dim
        ctx = positional_encoding(ctx_latents)
        mem = encode(ctx, self.params, self.num_heads)   # encoder runs exactly once

        if tgt_latents is not None:
            N_tgt = tgt_latents.shape[1]
            assert N_tgt == self.pred_len
            sos = jnp.zeros((B, 1, D), jnp.float32)
            dec_in = jnp.concatenate([sos, tgt_latents[:, :-1, :]], axis=1)
            dec = positional_encoding(dec_in)
            out = decode(dec, mem, self.params, self.num_heads)
            pred = linear(out.reshape(B * N_tgt, D),
                          self.params['proj_w'], self.params['proj_b']).reshape(B, N_tgt, D)
            loss = mse_loss(pred.reshape(B * N_tgt, D),
                            tgt_latents.reshape(B * N_tgt, D))
            return pred, loss
        else:
            # Shape-static autoregressive inference: fixed pred_len decoder
            # buffer + in-kernel causal mask, so every step reuses the same
            # compiled kernels (the causal mask makes unwritten future
            # positions invisible, matching the growing-prefix semantics).
            N_tgt = self.pred_len
            prev = jnp.zeros((B, N_tgt, D), jnp.float32)     # SOS at position 0
            preds = jnp.zeros((B, N_tgt, D), jnp.float32)
            for t in range(N_tgt):
                dec = positional_encoding(prev)
                out = decode(dec, mem, self.params, self.num_heads)
                nxt = linear(out[:, t, :], self.params['proj_w'],
                             self.params['proj_b'])          # (B, D)
                preds = preds.at[:, t, :].set(nxt)
                if t + 1 < N_tgt:
                    prev = prev.at[:, t + 1, :].set(nxt)
            return preds, None


# --------------------------------- main -------------------------------------

if __name__ == "__main__":
    key = jax.random.PRNGKey(0)
    k_ctx, k_tgt, k_params = jax.random.split(key, 3)

    B, N_ctx, D = 2, 8, 32
    prediction_steps, patch_size = 8, 2      # pred_len = 4
    model = JEPPredictorPallas(latent_dim=D,
                               prediction_steps=prediction_steps,
                               patch_size=patch_size,
                               num_layers=2,
                               num_heads=4,
                               key=k_params)

    ctx = jax.random.normal(k_ctx, (B, N_ctx, D), jnp.float32)
    tgt = jax.random.normal(k_tgt, (B, model.pred_len, D), jnp.float32)

    # Training-mode forward (teacher forcing) -> (pred, loss)
    pred, loss = model(ctx, tgt)
    jax.block_until_ready((pred, loss))
    assert pred.shape == (B, model.pred_len, D)
    assert loss.shape == ()
    assert bool(jnp.isfinite(loss))

    # Autoregressive inference forward -> (pred, None)
    pred_inf, loss_none = model(ctx)
    jax.block_until_ready(pred_inf)
    assert pred_inf.shape == (B, model.pred_len, D)
    assert loss_none is None
    assert bool(jnp.all(jnp.isfinite(pred_inf)))

    print("KERNEL_OK")
</pallas_src>

<mosaic_0001>
module attributes {stable_mosaic.version = 11 : i64} {
  func.func @_fused_mha_kernel(%arg0: i32, %arg1: i32, %arg2: memref<1x8x32xf32, #tpu.memory_space<vmem>>, %arg3: memref<1x8x32xf32, #tpu.memory_space<vmem>>, %arg4: memref<32x32xbf16, #tpu.memory_space<vmem>>, %arg5: memref<1x32xf32, #tpu.memory_space<vmem>>, %arg6: memref<32x32xbf16, #tpu.memory_space<vmem>>, %arg7: memref<1x32xf32, #tpu.memory_space<vmem>>, %arg8: memref<32x32xbf16, #tpu.memory_space<vmem>>, %arg9: memref<1x32xf32, #tpu.memory_space<vmem>>, %arg10: memref<32x32xbf16, #tpu.memory_space<vmem>>, %arg11: memref<1x32xf32, #tpu.memory_space<vmem>>, %arg12: memref<1x32xf32, #tpu.memory_space<vmem>>, %arg13: memref<1x32xf32, #tpu.memory_space<vmem>>, %arg14: memref<1x8x32xf32, #tpu.memory_space<vmem>>) attributes {dimension_semantics = [#tpu.dimension_semantics<parallel>, #tpu.dimension_semantics<parallel>], iteration_bounds = array<i64: 2, 1>, scalar_prefetch = 0 : i64, scratch_operands = 0 : i64, tpu.core_type = #tpu.core_type<tc>, window_params = [{transform_indices = @transform_0, window_bounds = array<i64: 1, 8, 32>}, {transform_indices = @transform_1, window_bounds = array<i64: 1, 8, 32>}, {pipeline_mode = #tpu.pipeline_mode<synchronous>, transform_indices = @transform_2, window_bounds = array<i64: 32, 32>}, {pipeline_mode = #tpu.pipeline_mode<synchronous>, transform_indices = @transform_3, window_bounds = array<i64: 1, 32>}, {pipeline_mode = #tpu.pipeline_mode<synchronous>, transform_indices = @transform_4, window_bounds = array<i64: 32, 32>}, {pipeline_mode = #tpu.pipeline_mode<synchronous>, transform_indices = @transform_5, window_bounds = array<i64: 1, 32>}, {pipeline_mode = #tpu.pipeline_mode<synchronous>, transform_indices = @transform_6, window_bounds = array<i64: 32, 32>}, {pipeline_mode = #tpu.pipeline_mode<synchronous>, transform_indices = @transform_7, window_bounds = array<i64: 1, 32>}, {pipeline_mode = #tpu.pipeline_mode<synchronous>, transform_indices = @transform_8, window_bounds = array<i64: 32, 32>}, {pipeline_mode = #tpu.pipeline_mode<synchronous>, transform_indices = @transform_9, window_bounds = array<i64: 1, 32>}, {pipeline_mode = #tpu.pipeline_mode<synchronous>, transform_indices = @transform_10, window_bounds = array<i64: 1, 32>}, {pipeline_mode = #tpu.pipeline_mode<synchronous>, transform_indices = @transform_11, window_bounds = array<i64: 1, 32>}, {transform_indices = @transform_12, window_bounds = array<i64: 1, 8, 32>}]} {
    %c0 = arith.constant 0 : index
    %c0_0 = arith.constant 0 : index
    %c0_1 = arith.constant 0 : index
    %0 = vector.load %arg2[%c0, %c0_0, %c0_1] : memref<1x8x32xf32, #tpu.memory_space<vmem>>, vector<1x8x32xf32>
    %1 = vector.shape_cast %0 : vector<1x8x32xf32> to vector<8x32xf32>
    %c0_2 = arith.constant 0 : index
    %c0_3 = arith.constant 0 : index
    %c0_4 = arith.constant 0 : index
    %2 = vector.load %arg3[%c0_2, %c0_3, %c0_4] : memref<1x8x32xf32, #tpu.memory_space<vmem>>, vector<1x8x32xf32>
    %3 = vector.shape_cast %2 : vector<1x8x32xf32> to vector<8x32xf32>
    %4 = arith.truncf %1 : vector<8x32xf32> to vector<8x32xbf16>
    %5 = arith.truncf %3 : vector<8x32xf32> to vector<8x32xbf16>
    %c0_5 = arith.constant 0 : index
    %c0_6 = arith.constant 0 : index
    %6 = vector.load %arg4[%c0_5, %c0_6] : memref<32x32xbf16, #tpu.memory_space<vmem>>, vector<32x32xbf16>
    %cst = arith.constant dense<0.000000e+00> : vector<8x32xf32>
    %7 = tpu.matmul %4, %6, %cst {dimension_numbers = #tpu.dot_dimension_numbers<[1], [0], [0], [1], [0, 0, 1, 1], [], []>} : vector<8x32xbf16>, vector<32x32xbf16>, vector<8x32xf32> -> vector<8x32xf32>
    %c0_7 = arith.constant 0 : index
    %c0_8 = arith.constant 0 : index
    %8 = vector.load %arg5[%c0_7, %c0_8] : memref<1x32xf32, #tpu.memory_space<vmem>>, vector<1x32xf32>
    %9 = vector.broadcast %8 : vector<1x32xf32> to vector<8x32xf32>
    %10 = arith.addf %7, %9 : vector<8x32xf32>
    %c0_9 = arith.constant 0 : index
    %c0_10 = arith.constant 0 : index
    %11 = vector.load %arg6[%c0_9, %c0_10] : memref<32x32xbf16, #tpu.memory_space<vmem>>, vector<32x32xbf16>
    %cst_11 = arith.constant dense<0.000000e+00> : vector<8x32xf32>
    %12 = tpu.matmul %5, %11, %cst_11 {dimension_numbers = #tpu.dot_dimension_numbers<[1], [0], [0], [1], [0, 0, 1, 1], [], []>} : vector<8x32xbf16>, vector<32x32xbf16>, vector<8x32xf32> -> vector<8x32xf32>
    %c0_12 = arith.constant 0 : index
    %c0_13 = arith.constant 0 : index
    %13 = vector.load %arg7[%c0_12, %c0_13] : memref<1x32xf32, #tpu.memory_space<vmem>>, vector<1x32xf32>
    %14 = vector.broadcast %13 : vector<1x32xf32> to vector<8x32xf32>
    %15 = arith.addf %12, %14 : vector<8x32xf32>
    %c0_14 = arith.constant 0 : index
    %c0_15 = arith.constant 0 : index
    %16 = vector.load %arg8[%c0_14, %c0_15] : memref<32x32xbf16, #tpu.memory_space<vmem>>, vector<32x32xbf16>
    %cst_16 = arith.constant dense<0.000000e+00> : vector<8x32xf32>
    %17 = tpu.matmul %5, %16, %cst_16 {dimension_numbers = #tpu.dot_dimension_numbers<[1], [0], [0], [1], [0, 0, 1, 1], [], []>} : vector<8x32xbf16>, vector<32x32xbf16>, vector<8x32xf32> -> vector<8x32xf32>
    %c0_17 = arith.constant 0 : index
    %c0_18 = arith.constant 0 : index
    %18 = vector.load %arg9[%c0_17, %c0_18] : memref<1x32xf32, #tpu.memory_space<vmem>>, vector<1x32xf32>
    %19 = vector.broadcast %18 : vector<1x32xf32> to vector<8x32xf32>
    %20 = arith.addf %17, %19 : vector<8x32xf32>
    %21 = arith.truncf %10 : vector<8x32xf32> to vector<8x32xbf16>
    %22 = arith.truncf %15 : vector<8x32xf32> to vector<8x32xbf16>
    %23 = arith.truncf %20 : vector<8x32xf32> to vector<8x32xbf16>
    %24 = vector.extract_strided_slice %21 {offsets = [0, 0], sizes = [8, 8], strides = [1, 1]} : vector<8x32xbf16> to vector<8x8xbf16>
    %25 = vector.extract_strided_slice %22 {offsets = [0, 0], sizes = [8, 8], strides = [1, 1]} : vector<8x32xbf16> to vector<8x8xbf16>
    %cst_19 = arith.constant dense<0.000000e+00> : vector<8x8xf32>
    %26 = tpu.matmul %24, %25, %cst_19 {dimension_numbers = #tpu.dot_dimension_numbers<[1], [1], [0], [0], [0, 0, 1, 0], [], []>} : vector<8x8xbf16>, vector<8x8xbf16>, vector<8x8xf32> -> vector<8x8xf32>
    %cst_20 = arith.constant 0.353553385 : f32
    %27 = vector.broadcast %cst_20 : f32 to vector<8x8xf32>
    %28 = arith.mulf %26, %27 : vector<8x8xf32>
    %cst_21 = arith.constant dense<0xFF800000> : vector<8xf32>
    %29 = vector.multi_reduction <maximumf>, %28, %cst_21 [1] : vector<8x8xf32> to vector<8xf32>
    %30 = vector.shape_cast %29 : vector<8xf32> to vector<8x1xf32>
    %31 = vector.broadcast %30 : vector<8x1xf32> to vector<8x8xf32>
    %32 = arith.subf %28, %31 : vector<8x8xf32>
    %33 = math.exp %32 : vector<8x8xf32>
    %cst_22 = arith.constant dense<0.000000e+00> : vector<8xf32>
    %34 = vector.multi_reduction <add>, %33, %cst_22 [1] : vector<8x8xf32> to vector<8xf32>
    %35 = vector.shape_cast %34 : vector<8xf32> to vector<8x1xf32>
    %36 = tpu.reciprocal %35 {approx = true} : vector<8x1xf32> -> vector<8x1xf32>
    %37 = vector.broadcast %36 : vector<8x1xf32> to vector<8x8xf32>
    %38 = arith.mulf %33, %37 : vector<8x8xf32>
    %39 = arith.truncf %38 : vector<8x8xf32> to vector<8x8xbf16>
    %40 = vector.extract_strided_slice %23 {offsets = [0, 0], sizes = [8, 8], strides = [1, 1]} : vector<8x32xbf16> to vector<8x8xbf16>
    %cst_23 = arith.constant dense<0.000000e+00> : vector<8x8xf32>
    %41 = tpu.matmul %39, %40, %cst_23 {dimension_numbers = #tpu.dot_dimension_numbers<[1], [0], [0], [1], [0, 0, 1, 1], [], []>} : vector<8x8xbf16>, vector<8x8xbf16>, vector<8x8xf32> -> vector<8x8xf32>
    %42 = vector.extract_strided_slice %21 {offsets = [0, 8], sizes = [8, 8], strides = [1, 1]} : vector<8x32xbf16> to vector<8x8xbf16>
    %43 = vector.extract_strided_slice %22 {offsets = [0, 8], sizes = [8, 8], strides = [1, 1]} : vector<8x32xbf16> to vector<8x8xbf16>
    %cst_24 = arith.constant dense<0.000000e+00> : vector<8x8xf32>
    %44 = tpu.matmul %42, %43, %cst_24 {dimension_numbers = #tpu.dot_dimension_numbers<[1], [1], [0], [0], [0, 0, 1, 0], [], []>} : vector<8x8xbf16>, vector<8x8xbf16>, vector<8x8xf32> -> vector<8x8xf32>
    %cst_25 = arith.constant 0.353553385 : f32
    %45 = vector.broadcast %cst_25 : f32 to vector<8x8xf32>
    %46 = arith.mulf %44, %45 : vector<8x8xf32>
    %cst_26 = arith.constant dense<0xFF800000> : vector<8xf32>
    %47 = vector.multi_reduction <maximumf>, %46, %cst_26 [1] : vector<8x8xf32> to vector<8xf32>
    %48 = vector.shape_cast %47 : vector<8xf32> to vector<8x1xf32>
    %49 = vector.broadcast %48 : vector<8x1xf32> to vector<8x8xf32>
    %50 = arith.subf %46, %49 : vector<8x8xf32>
    %51 = math.exp %50 : vector<8x8xf32>
    %cst_27 = arith.constant dense<0.000000e+00> : vector<8xf32>
    %52 = vector.multi_reduction <add>, %51, %cst_27 [1] : vector<8x8xf32> to vector<8xf32>
    %53 = vector.shape_cast %52 : vector<8xf32> to vector<8x1xf32>
    %54 = tpu.reciprocal %53 {approx = true} : vector<8x1xf32> -> vector<8x1xf32>
    %55 = vector.broadcast %54 : vector<8x1xf32> to vector<8x8xf32>
    %56 = arith.mulf %51, %55 : vector<8x8xf32>
    %57 = arith.truncf %56 : vector<8x8xf32> to vector<8x8xbf16>
    %58 = vector.extract_strided_slice %23 {offsets = [0, 8], sizes = [8, 8], strides = [1, 1]} : vector<8x32xbf16> to vector<8x8xbf16>
    %cst_28 = arith.constant dense<0.000000e+00> : vector<8x8xf32>
    %59 = tpu.matmul %57, %58, %cst_28 {dimension_numbers = #tpu.dot_dimension_numbers<[1], [0], [0], [1], [0, 0, 1, 1], [], []>} : vector<8x8xbf16>, vector<8x8xbf16>, vector<8x8xf32> -> vector<8x8xf32>
    %60 = vector.extract_strided_slice %21 {offsets = [0, 16], sizes = [8, 8], strides = [1, 1]} : vector<8x32xbf16> to vector<8x8xbf16>
    %61 = vector.extract_strided_slice %22 {offsets = [0, 16], sizes = [8, 8], strides = [1, 1]} : vector<8x32xbf16> to vector<8x8xbf16>
    %cst_29 = arith.constant dense<0.000000e+00> : vector<8x8xf32>
    %62 = tpu.matmul %60, %61, %cst_29 {dimension_numbers = #tpu.dot_dimension_numbers<[1], [1], [0], [0], [0, 0, 1, 0], [], []>} : vector<8x8xbf16>, vector<8x8xbf16>, vector<8x8xf32> -> vector<8x8xf32>
    %cst_30 = arith.constant 0.353553385 : f32
    %63 = vector.broadcast %cst_30 : f32 to vector<8x8xf32>
    %64 = arith.mulf %62, %63 : vector<8x8xf32>
    %cst_31 = arith.constant dense<0xFF800000> : vector<8xf32>
    %65 = vector.multi_reduction <maximumf>, %64, %cst_31 [1] : vector<8x8xf32> to vector<8xf32>
    %66 = vector.shape_cast %65 : vector<8xf32> to vector<8x1xf32>
    %67 = vector.broadcast %66 : vector<8x1xf32> to vector<8x8xf32>
    %68 = arith.subf %64, %67 : vector<8x8xf32>
    %69 = math.exp %68 : vector<8x8xf32>
    %cst_32 = arith.constant dense<0.000000e+00> : vector<8xf32>
    %70 = vector.multi_reduction <add>, %69, %cst_32 [1] : vector<8x8xf32> to vector<8xf32>
    %71 = vector.shape_cast %70 : vector<8xf32> to vector<8x1xf32>
    %72 = tpu.reciprocal %71 {approx = true} : vector<8x1xf32> -> vector<8x1xf32>
    %73 = vector.broadcast %72 : vector<8x1xf32> to vector<8x8xf32>
    %74 = arith.mulf %69, %73 : vector<8x8xf32>
    %75 = arith.truncf %74 : vector<8x8xf32> to vector<8x8xbf16>
    %76 = vector.extract_strided_slice %23 {offsets = [0, 16], sizes = [8, 8], strides = [1, 1]} : vector<8x32xbf16> to vector<8x8xbf16>
    %cst_33 = arith.constant dense<0.000000e+00> : vector<8x8xf32>
    %77 = tpu.matmul %75, %76, %cst_33 {dimension_numbers = #tpu.dot_dimension_numbers<[1], [0], [0], [1], [0, 0, 1, 1], [], []>} : vector<8x8xbf16>, vector<8x8xbf16>, vector<8x8xf32> -> vector<8x8xf32>
    %78 = vector.extract_strided_slice %21 {offsets = [0, 24], sizes = [8, 8], strides = [1, 1]} : vector<8x32xbf16> to vector<8x8xbf16>
    %79 = vector.extract_strided_slice %22 {offsets = [0, 24], sizes = [8, 8], strides = [1, 1]} : vector<8x32xbf16> to vector<8x8xbf16>
    %cst_34 = arith.constant dense<0.000000e+00> : vector<8x8xf32>
    %80 = tpu.matmul %78, %79, %cst_34 {dimension_numbers = #tpu.dot_dimension_numbers<[1], [1], [0], [0], [0, 0, 1, 0], [], []>} : vector<8x8xbf16>, vector<8x8xbf16>, vector<8x8xf32> -> vector<8x8xf32>
    %cst_35 = arith.constant 0.353553385 : f32
    %81 = vector.broadcast %cst_35 : f32 to vector<8x8xf32>
    %82 = arith.mulf %80, %81 : vector<8x8xf32>
    %cst_36 = arith.constant dense<0xFF800000> : vector<8xf32>
    %83 = vector.multi_reduction <maximumf>, %82, %cst_36 [1] : vector<8x8xf32> to vector<8xf32>
    %84 = vector.shape_cast %83 : vector<8xf32> to vector<8x1xf32>
    %85 = vector.broadcast %84 : vector<8x1xf32> to vector<8x8xf32>
    %86 = arith.subf %82, %85 : vector<8x8xf32>
    %87 = math.exp %86 : vector<8x8xf32>
    %cst_37 = arith.constant dense<0.000000e+00> : vector<8xf32>
    %88 = vector.multi_reduction <add>, %87, %cst_37 [1] : vector<8x8xf32> to vector<8xf32>
    %89 = vector.shape_cast %88 : vector<8xf32> to vector<8x1xf32>
    %90 = tpu.reciprocal %89 {approx = true} : vector<8x1xf32> -> vector<8x1xf32>
    %91 = vector.broadcast %90 : vector<8x1xf32> to vector<8x8xf32>
    %92 = arith.mulf %87, %91 : vector<8x8xf32>
    %93 = arith.truncf %92 : vector<8x8xf32> to vector<8x8xbf16>
    %94 = vector.extract_strided_slice %23 {offsets = [0, 24], sizes = [8, 8], strides = [1, 1]} : vector<8x32xbf16> to vector<8x8xbf16>
    %cst_38 = arith.constant dense<0.000000e+00> : vector<8x8xf32>
    %95 = tpu.matmul %93, %94, %cst_38 {dimension_numbers = #tpu.dot_dimension_numbers<[1], [0], [0], [1], [0, 0, 1, 1], [], []>} : vector<8x8xbf16>, vector<8x8xbf16>, vector<8x8xf32> -> vector<8x8xf32>
    %96 = tpu.concatenate %41, %59, %77, %95 in 1 : vector<8x8xf32>, vector<8x8xf32>, vector<8x8xf32>, vector<8x8xf32> -> vector<8x32xf32>
    %97 = arith.truncf %96 : vector<8x32xf32> to vector<8x32xbf16>
    %c0_39 = arith.constant 0 : index
    %c0_40 = arith.constant 0 : index
    %98 = vector.load %arg10[%c0_39, %c0_40] : memref<32x32xbf16, #tpu.memory_space<vmem>>, vector<32x32xbf16>
    %cst_41 = arith.constant dense<0.000000e+00> : vector<8x32xf32>
    %99 = tpu.matmul %97, %98, %cst_41 {dimension_numbers = #tpu.dot_dimension_numbers<[1], [0], [0], [1], [0, 0, 1, 1], [], []>} : vector<8x32xbf16>, vector<32x32xbf16>, vector<8x32xf32> -> vector<8x32xf32>
    %100 = arith.addf %1, %99 : vector<8x32xf32>
    %c0_42 = arith.constant 0 : index
    %c0_43 = arith.constant 0 : index
    %101 = vector.load %arg11[%c0_42, %c0_43] : memref<1x32xf32, #tpu.memory_space<vmem>>, vector<1x32xf32>
    %102 = vector.broadcast %101 : vector<1x32xf32> to vector<8x32xf32>
    %103 = arith.addf %100, %102 : vector<8x32xf32>
    %cst_44 = arith.constant dense<0.000000e+00> : vector<8xf32>
    %104 = vector.multi_reduction <add>, %103, %cst_44 [1] : vector<8x32xf32> to vector<8xf32>
    %105 = vector.shape_cast %104 : vector<8xf32> to vector<8x1xf32>
    %cst_45 = arith.constant 3.200000e+01 : f32
    %106 = vector.broadcast %cst_45 : f32 to vector<8x1xf32>
    %107 = arith.divf %105, %106 : vector<8x1xf32>
    %108 = vector.broadcast %107 : vector<8x1xf32> to vector<8x32xf32>
    %109 = arith.subf %103, %108 : vector<8x32xf32>
    %110 = arith.mulf %109, %109 : vector<8x32xf32>
    %cst_46 = arith.constant dense<0.000000e+00> : vector<8xf32>
    %111 = vector.multi_reduction <add>, %110, %cst_46 [1] : vector<8x32xf32> to vector<8xf32>
    %112 = vector.shape_cast %111 : vector<8xf32> to vector<8x1xf32>
    %cst_47 = arith.constant 3.200000e+01 : f32
    %113 = vector.broadcast %cst_47 : f32 to vector<8x1xf32>
    %114 = arith.divf %112, %113 : vector<8x1xf32>
    %115 = vector.broadcast %107 : vector<8x1xf32> to vector<8x32xf32>
    %116 = arith.subf %103, %115 : vector<8x32xf32>
    %cst_48 = arith.constant 9.99999974E-6 : f32
    %117 = vector.broadcast %cst_48 : f32 to vector<8x1xf32>
    %118 = arith.addf %114, %117 : vector<8x1xf32>
    %119 = math.rsqrt %118 : vector<8x1xf32>
    %120 = vector.broadcast %119 : vector<8x1xf32> to vector<8x32xf32>
    %121 = arith.mulf %116, %120 : vector<8x32xf32>
    %c0_49 = arith.constant 0 : index
    %c0_50 = arith.constant 0 : index
    %122 = vector.load %arg12[%c0_49, %c0_50] : memref<1x32xf32, #tpu.memory_space<vmem>>, vector<1x32xf32>
    %123 = vector.broadcast %122 : vector<1x32xf32> to vector<8x32xf32>
    %124 = arith.mulf %121, %123 : vector<8x32xf32>
    %c0_51 = arith.constant 0 : index
    %c0_52 = arith.constant 0 : index
    %125 = vector.load %arg13[%c0_51, %c0_52] : memref<1x32xf32, #tpu.memory_space<vmem>>, vector<1x32xf32>
    %126 = vector.broadcast %125 : vector<1x32xf32> to vector<8x32xf32>
    %127 = arith.addf %124, %126 : vector<8x32xf32>
    %c0_53 = arith.constant 0 : index
    %c0_54 = arith.constant 0 : index
    %c0_55 = arith.constant 0 : index
    %128 = vector.load %arg14[%c0_53, %c0_54, %c0_55] : memref<1x8x32xf32, #tpu.memory_space<vmem>>, vector<1x8x32xf32>
    %129 = vector.shape_cast %128 : vector<1x8x32xf32> to vector<8x32xf32>
    %130 = vector.shape_cast %127 : vector<8x32xf32> to vector<1x8x32xf32>
    tpu.vector_store %arg14[%c0_53, %c0_54, %c0_55], %130 {strides = array<i32>} : memref<1x8x32xf32, #tpu.memory_space<vmem>>, vector<1x8x32xf32>,
    return
  }
  func.func @transform_0(%arg0: i32, %arg1: i32) -> (i32, i32, i32) {
    %c0_i32 = arith.constant 0 : i32
    %c0_i32_0 = arith.constant 0 : i32
    return %arg0, %arg1, %c0_i32 : i32, i32, i32
  }
  func.func @transform_1(%arg0: i32, %arg1: i32) -> (i32, i32, i32) {
    %c0_i32 = arith.constant 0 : i32
    %c0_i32_0 = arith.constant 0 : i32
    %c0_i32_1 = arith.constant 0 : i32
    return %arg0, %c0_i32, %c0_i32_0 : i32, i32, i32
  }
  func.func @transform_2(%arg0: i32, %arg1: i32) -> (i32, i32) {
    %c0_i32 = arith.constant 0 : i32
    %c0_i32_0 = arith.constant 0 : i32
    %c0_i32_1 = arith.constant 0 : i32
    return %c0_i32, %c0_i32_0 : i32, i32
  }
  func.func @transform_3(%arg0: i32, %arg1: i32) -> (i32, i32) {
    %c0_i32 = arith.constant 0 : i32
    %c0_i32_0 = arith.constant 0 : i32
    %c0_i32_1 = arith.constant 0 : i32
    return %c0_i32, %c0_i32_0 : i32, i32
  }
  func.func @transform_4(%arg0: i32, %arg1: i32) -> (i32, i32) {
    %c0_i32 = arith.constant 0 : i32
    %c0_i32_0 = arith.constant 0 : i32
    %c0_i32_1 = arith.constant 0 : i32
    return %c0_i32, %c0_i32_0 : i32, i32
  }
  func.func @transform_5(%arg0: i32, %arg1: i32) -> (i32, i32) {
    %c0_i32 = arith.constant 0 : i32
    %c0_i32_0 = arith.constant 0 : i32
    %c0_i32_1 = arith.constant 0 : i32
    return %c0_i32, %c0_i32_0 : i32, i32
  }
  func.func @transform_6(%arg0: i32, %arg1: i32) -> (i32, i32) {
    %c0_i32 = arith.constant 0 : i32
    %c0_i32_0 = arith.constant 0 : i32
    %c0_i32_1 = arith.constant 0 : i32
    return %c0_i32, %c0_i32_0 : i32, i32
  }
  func.func @transform_7(%arg0: i32, %arg1: i32) -> (i32, i32) {
    %c0_i32 = arith.constant 0 : i32
    %c0_i32_0 = arith.constant 0 : i32
    %c0_i32_1 = arith.constant 0 : i32
    return %c0_i32, %c0_i32_0 : i32, i32
  }
  func.func @transform_8(%arg0: i32, %arg1: i32) -> (i32, i32) {
    %c0_i32 = arith.constant 0 : i32
    %c0_i32_0 = arith.constant 0 : i32
    %c0_i32_1 = arith.constant 0 : i32
    return %c0_i32, %c0_i32_0 : i32, i32
  }
  func.func @transform_9(%arg0: i32, %arg1: i32) -> (i32, i32) {
    %c0_i32 = arith.constant 0 : i32
    %c0_i32_0 = arith.constant 0 : i32
    %c0_i32_1 = arith.constant 0 : i32
    return %c0_i32, %c0_i32_0 : i32, i32
  }
  func.func @transform_10(%arg0: i32, %arg1: i32) -> (i32, i32) {
    %c0_i32 = arith.constant 0 : i32
    %c0_i32_0 = arith.constant 0 : i32
    %c0_i32_1 = arith.constant 0 : i32
    return %c0_i32, %c0_i32_0 : i32, i32
  }
  func.func @transform_11(%arg0: i32, %arg1: i32) -> (i32, i32) {
    %c0_i32 = arith.constant 0 : i32
    %c0_i32_0 = arith.constant 0 : i32
    %c0_i32_1 = arith.constant 0 : i32
    return %c0_i32, %c0_i32_0 : i32, i32
  }
  func.func @transform_12(%arg0: i32, %arg1: i32) -> (i32, i32, i32) {
    %c0_i32 = arith.constant 0 : i32
    %c0_i32_0 = arith.constant 0 : i32
    return %arg0, %arg1, %c0_i32 : i32, i32, i32
  }
}

</mosaic_0001>

<bundles_post_ra>
// kernel: tpu_custom_call.1
= control target key start
LH: loop header
LB: loop body
LE: loop exit
PB: predicated region body
PF: predicated region fallthrough
CT: control target
= control target key end

     0   :  { %s2478_s0 = inlined_call_operand.hbm [shape: f32[2,8,32], index: 0, kind: input, shape index: {}]   ;;  %s2479_s1 = inlined_call_operand.hbm [shape: f32[2,8,32], index: 1, kind: input, shape index: {}]   ;;  %s2480_s2 = inlined_call_operand.hbm [shape: bf16[32,32], index: 2, kind: input, shape index: {}]   ;;  %s2481_s3 = inlined_call_operand.vmem [shape: f32[1,32], index: 3, kind: input, shape index: {}]   ;;  %s2482_s4 = inlined_call_operand.hbm [shape: bf16[32,32], index: 4, kind: input, shape index: {}]   ;;  %s2483_s5 = inlined_call_operand.vmem [shape: f32[1,32], index: 5, kind: input, shape index: {}]   ;;  %s2484_s6 = inlined_call_operand.vmem [shape: bf16[32,32], index: 6, kind: input, shape index: {}]   ;;  %s2485_s7 = inlined_call_operand.vmem [shape: f32[1,32], index: 7, kind: input, shape index: {}]   ;;  %s2486_s8 = inlined_call_operand.hbm [shape: bf16[32,32], index: 8, kind: input, shape index: {}]   ;;  %s2487_s9 = inlined_call_operand.vmem [shape: f32[1,32], index: 9, kind: input, shape index: {}]   ;;  %s2488_s10 = inlined_call_operand.vmem [shape: f32[1,32], index: 10, kind: input, shape index: {}]   ;;  %s2489_s11 = inlined_call_operand.vmem [shape: f32[1,32], index: 11, kind: input, shape index: {}]   ;;  %s2490_s12 = inlined_call_operand.hbm [shape: f32[2,8,32], index: 12, kind: output, shape index: {}]  }
   0x1   :  { %2498 = sst [smem:[#allocation20_spill]] %s2480_s2 }
   0x2   :  { %2499 = sst [smem:[#allocation21_spill]] %s2482_s4 }
   0x3   :  { %2500 = sst [smem:[#allocation22_spill]] %s2485_s7 }
   0x4   :  { %2501 = sst [smem:[#allocation23_spill]] %s2486_s8 }
   0x5   :  { %2502 = sst [smem:[#allocation24_spill]] %s2487_s9 }
   0x6   :  { %2503 = sst [smem:[#allocation25_spill]] %s2488_s10 }
   0x7   :  { %2504 = sst [smem:[#allocation26_spill]] %s2489_s11 }
   0x8   :  { %2505 = sst [smem:[#allocation27_spill]] %s2490_s12 }
   0x9   :  { %17 = vsyncpa [#allocation3], 0 }
   0xa   :  { %19 = vsyncpa [#allocation3 + $0x1], 0 }
   0xb   :  { %20 = vsyncpa [#allocation6], 0 }
   0xc   :  { %22 = vsyncpa [#allocation6 + $0x1], 0 }
   0xd   :  { %23 = vsyncpa [#allocation9], 0 }
   0xe   :  { %24 = vsyncpa [#allocation4], 0 }
   0xf   :  { %26 = vsyncpa [#allocation4 + $0x1], 0  ;;  %s2047_s21 = smov 0   ;;  %s2049_s22 = smov 0  }
  0x10   :  { %s2051_s23 = smov 0   ;;  %s2053_s24 = smov 0  }
  0x11   :  { %s2055_s25 = smov 0   ;;  %s2057_s26 = smov 0  }
  0x12 LB: > { %2506 = sst [smem:[#allocation17_spill]] %s1944_s21  ;;  %s2078_s27 = sadd.s32 4294967295, %s1964_s26   ;;  %s1964_s26 = sphi %s2057_s26, %s32_s26   ;;  %s1960_s25 = sphi %s2055_s25, %s2541_s25   ;;  %s1956_s24 = sphi %s2053_s24, %s2540_s24   ;;  %s1952_s23 = sphi %s2051_s23, %s2539_s23   ;;  %s1948_s22 = sphi %s2049_s22, %s2538_s22   ;;  %s1944_s21 = sphi %s2047_s21, %s2537_s21  }
  0x13   : > { %2507 = sst [smem:[#allocation18_spill]] %s1956_s24  ;;  %s1437_s28 = sadd.s32 4294967294, %s1964_s26  }
  0x14   : > { %p66_p0 = scmp.ne.s32.totalorder %s1948_s22, %s1944_s21  ;;  %p2494_p1 = scmp.eq.s32.totalorder %s2078_s27, 0 }
  0x15   : > { %p334_p3 = scmp.eq.s32.totalorder %s1437_s28, 1  ;;  %p1438_p5 = scmp.ge.s32.totalorder %s1964_s26, 1 }
  0x16   : > { %p2087_p4 = por %p2494_p1, %p66_p0  ;;  %p341_p7 = scmp.lt.s32.totalorder %s1964_s26, 3 }
  0x17   : > { %p2092_p6 = por %p334_p3, %p66_p0  ;;  %s1966_s14 = smov [#allocation7]  }
  0x18   : > { %s2508_s29 = scalar_select %p2087_p4, 1, 0 }
  0x19   : > { %s2509_s30 = scalar_select %p2092_p6, 1, 0 }
  0x1a   : > { %p2097_p8 = pnand %p1438_p5, %p341_p7  ;;  %s353_s15 = sshll.u32 %s1966_s14, 4  ;;  %s2101_s15 = int_to_ptr.vmem [resolvable:$true] %s353_s15 }
  0x1b   : > { %2510 = sst [smem:[#allocation19_spill]] %s2509_s30  ;;  %s1967_s17 = smov [#allocation8]  }
  0x1c   : > { %s2511_s13 = scalar_select %p2097_p8, 1, 0 }
  0x1d   : > { %p1610_p9 = pneg %p2097_p8  ;;  %s369_s18 = sshll.u32 %s1967_s17, 4  ;;  %s2112_s18 = int_to_ptr.vmem [resolvable:$true] %s369_s18 }
  0x1e   : > { %s1968_s19 = smov [#allocation10]   ;;  %s2513_s2 = sld [smem:[#allocation20_spill]] }
  0x1f   : > { %p2108_p11 = pnand %p1610_p9, %p2494_p1  ;;  %s2114_s20 = sshll.u32 %s1968_s19, 4  ;;  %s392_s20 = int_to_ptr.vmem [resolvable:$true] %s2114_s20 }
  0x21   : > { %p2124_p13 = pneg %p2108_p11 }
  0x24   : > { %s1726_s30 = scalar_lea.hbm %s2513_s2, 256 }
  0x25   : > { %p1727_p12 = scmp.ne.s32.totalorder %s2513_s2, %s1726_s30  ;;  %p1733_p5 = scmp.lt.u32.totalorder %s1726_s30, %s2513_s2 }
  0x27   : > { %p1729_p0 = pnand %p2124_p13, %p1727_p12 }
  0x29   : > { %p1730_p3 = pneg %p1729_p0 }
  0x2b   : > { %p1735_p7 = pnand %p1733_p5, %p1730_p3 }
  0x2d   : > { %1738 = shalt.err (!%p1735_p7)
}
  0x2e   : > { %s1739_s12 = scalar_lea.vmem %s2101_s15, 256  ;;  %p1747_p2 = scmp.lt.s32.totalorder %s2101_s15, %s2101_s15 }
  0x2f   : > { %p1740_p9 = scmp.ne.s32.totalorder %s2101_s15, %s1739_s12  ;;  %p1748_p6 = scmp.lt.s32.totalorder %s1739_s12, %s1739_s12 }
  0x31   : > { %p1742_p10 = pnand %p1740_p9, %p2124_p13  ;;  %p1749_p12 = por %p1748_p6, %p1747_p2 }
  0x33   : > { %p1743_p1 = pneg %p1742_p10 }
  0x35   : > { %p1750_p0 = pnand %p1749_p12, %p1743_p1 }
  0x37   : > { %1753 = shalt.err (!%p1750_p0)
}
  0x38   : > { %s1969_s21 = smov 64   ;;  %s1970_s30 = smov 4  }
  0x39   : > { %1613 = dma.hbm_to_vmem [thread:$0]  (!%p2108_p11), %s2513_s2, 256, %s2101_s15, [#allocation6], %s1969_s21, %s1969_s21, %s1970_s30  }
  0x3a   : > { %s2515_s4 = sld [smem:[#allocation21_spill]] }
  0x40   : > { %s1754_s12 = scalar_lea.hbm %s2515_s4, 256 }
  0x41   : > { %p1755_p1 = scmp.ne.s32.totalorder %s2515_s4, %s1754_s12  ;;  %p1761_p10 = scmp.lt.u32.totalorder %s1754_s12, %s2515_s4 }
  0x43   : > { %p1757_p2 = pnand %p1755_p1, %p2124_p13 }
  0x45   : > { %p1758_p6 = pneg %p1757_p2 }
  0x47   : > { %p1763_p3 = pnand %p1761_p10, %p1758_p6 }
  0x49   : > { %1766 = shalt.err (!%p1763_p3)
}
  0x4a   : > { %s1767_s15 = scalar_lea.vmem %s2112_s18, 256  ;;  %p1775_p12 = scmp.lt.s32.totalorder %s2112_s18, %s2112_s18 }
  0x4b   : > { %p1768_p5 = scmp.ne.s32.totalorder %s2112_s18, %s1767_s15  ;;  %p1776_p0 = scmp.lt.s32.totalorder %s1767_s15, %s1767_s15 }
  0x4d   : > { %p1770_p7 = pnand %p1768_p5, %p2124_p13  ;;  %p1777_p1 = por %p1776_p0, %p1775_p12 }
  0x4f   : > { %p1771_p9 = pneg %p1770_p7 }
  0x51   : > { %p1778_p2 = pnand %p1777_p1, %p1771_p9 }
  0x53   : > { %1781 = shalt.err (!%p1778_p2)
}
  0x54   : > { %1616 = dma.hbm_to_vmem [thread:$0]  (!%p2108_p11), %s2515_s4, 256, %s2112_s18, [#allocation9], %s1969_s21, %s1969_s21, %s1970_s30  }
  0x55   : > { %s2516_s8 = sld [smem:[#allocation23_spill]] }
  0x5b   : > { %s1782_s28 = scalar_lea.hbm %s2516_s8, 256 }
  0x5c   : > { %p1783_p6 = scmp.ne.s32.totalorder %s2516_s8, %s1782_s28  ;;  %p1789_p5 = scmp.lt.u32.totalorder %s1782_s28, %s2516_s8 }
  0x5e   : > { %p1785_p10 = pnand %p1783_p6, %p2124_p13 }
  0x60   : > { %p1786_p3 = pneg %p1785_p10 }
  0x62   : > { %p1791_p7 = pnand %p1789_p5, %p1786_p3 }
  0x64   : > { %1794 = shalt.err (!%p1791_p7)
}
  0x65   : > { %s1795_s15 = scalar_lea.vmem %s392_s20, 256  ;;  %p1803_p1 = scmp.lt.s32.totalorder %s392_s20, %s392_s20 }
  0x66   : > { %p1796_p9 = scmp.ne.s32.totalorder %s392_s20, %s1795_s15  ;;  %p1804_p2 = scmp.lt.s32.totalorder %s1795_s15, %s1795_s15 }
  0x68   : > { %p1798_p12 = pnand %p1796_p9, %p2124_p13  ;;  %p1805_p4 = por %p1804_p2, %p1803_p1 }
  0x6a   : > { %p1799_p0 = pneg %p1798_p12 }
  0x6c   : > { %p1806_p8 = pnand %p1805_p4, %p1799_p0 }
  0x6e   : > { %1809 = shalt.err (!%p1806_p8)
}
  0x6f   : > { %1619 = dma.hbm_to_vmem [thread:$0]  (!%p2108_p11), %s2516_s8, 256, %s392_s20, [#allocation9], %s1969_s21, %s1969_s21, %s1970_s30  }
  0x70   : > { %s53_s11 = sadd.s32 1, %s1952_s23  ;;  %s44_s16 = sadd.s32 1, %s1960_s25 }
  0x71   : > { %p60_p4 = scmp.ne.s32.totalorder %s1952_s23, %s1948_s22  ;;  %p46_p8 = scmp.ge.s32.totalorder %s44_s16, 2 }
  0x72   : > { %p61_p13 = scmp.eq.s32.totalorder %s1964_s26, 0  ;;  %p2517_p6 = scmp.eq.s32.totalorder %s2078_s27, 1 }
  0x73   : > { %p1634_p3 = scmp.lt.s32.totalorder %s1964_s26, 2  ;;  %s2543_s16 = smov (%p46_p8, %s44_s16), 0 }
  0x74   : > { %p2203_p10 = por %p2517_p6, %p60_p4  ;;  %p62_p5 = por %p61_p13, %p60_p4 }
  0x75   : > { %s414_s10 = sand.u32 1, %s1952_s23   ;;  %s48_s24 = ssub.s32 %s1960_s25, %s2543_s16 }
  0x76   : > { %s2518_s9 = scalar_select %p2203_p10, 1, 0 }
  0x77   : > { %p51_p11 = scmp.eq.s32.totalorder %s48_s24, 0  ;;  %s2213_s20 = sshll.u32 %s414_s10, 3 }
  0x78   : > { %s1444_s21 = sshll.u32 %s1960_s25, 7  ;;  %s418_s19 = scalar_lea.vmem [#allocation2], %s2213_s20 }
  0x79   : > { %s2217_s30 = scalar_select %p51_p11, %s1952_s23, %s53_s11  }
  0x7a   : > { %s2222_s17 = scalar_lea.hbm %s2478_s0, %s1444_s21  ;;  %s426_s12 = sshll.u32 %s418_s19, 4  ;;  %s2225_s12 = int_to_ptr.vmem [resolvable:$true] %s426_s12 }
  0x7b   : > { %p2229_p7 = pnand %p1634_p3, %p62_p5  ;;  %s2236_s11 = scalar_lea.hbm %s2479_s1, %s1444_s21 }
  0x7c   : > { %s433_s24 = sand.u32 1, %s1964_s26   ;;  %s415_s28 = scalar_lea.sflag [#allocation3], %s414_s10 }
  0x7d   : > { %s1810_s14 = scalar_lea.hbm %s2222_s17, 128  ;;  %p1812_p12 = pneg %p2229_p7 }
  0x7e   : > { %p1811_p9 = scmp.ne.s32.totalorder %s2222_s17, %s1810_s14  ;;  %s1815_s4 = scalar_lea.hbm %s2478_s0, 256 }
  0x7f   : > { %p1816_p2 = scmp.lt.u32.totalorder %s2222_s17, %s2478_s0  ;;  %p1817_p4 = scmp.lt.u32.totalorder %s1815_s4, %s1810_s14 }
  0x80   : > { %p1813_p0 = pnand %p1812_p12, %p1811_p9  ;;  %p1819_p13 = scmp.lt.u32.totalorder %s1810_s14, %s2222_s17 }
  0x81   : > { %p1818_p8 = por %p1817_p4, %p1816_p2 }
  0x82   : > { %p1814_p1 = pneg %p1813_p0 }
  0x83   : > { %p1820_p6 = por %p1819_p13, %p1818_p8 }
  0x85   : > { %p1821_p3 = pnand %p1820_p6, %p1814_p1 }
  0x87   : > { %1824 = shalt.err (!%p1821_p3)
}
  0x88   : > { %s1825_s10 = scalar_lea.vmem %s2225_s12, 128  ;;  %s1971_s2 = smov [#allocation2]  }
  0x89   : > { %p1826_p5 = scmp.ne.s32.totalorder %s2225_s12, %s1825_s10  ;;  %s1830_s21 = sshll.u32 %s1971_s2, 4  ;;  %s1831_s21 = int_to_ptr.vmem [resolvable:$false] %s1830_s21 }
  0x8a   : > { %s1832_s8 = scalar_lea.vmem %s1831_s21, 256  ;;  %p1833_p0 = scmp.lt.s32.totalorder %s2225_s12, %s1831_s21 }
  0x8b   : > { %p1828_p11 = pnand %p1826_p5, %p1812_p12  ;;  %p1834_p2 = scmp.lt.s32.totalorder %s1832_s8, %s1825_s10 }
  0x8d   : > { %p1829_p9 = pneg %p1828_p11  ;;  %p1835_p4 = por %p1834_p2, %p1833_p0 }
  0x8f   : > { %p1836_p8 = pnand %p1835_p4, %p1829_p9 }
  0x91   : > { %1839 = shalt.err (!%p1836_p8)
}
  0x92   : > { %1623 = dma.hbm_to_vmem [thread:$0]  (!%p2229_p7), %s2222_s17, 128, %s2225_s12, %s415_s28  }
  0x93   : > { %s437_s4 = scalar_lea.vmem [#allocation5], %s2213_s20  ;;  %s434_s14 = scalar_lea.sflag [#allocation6], %s433_s24 }
  0x94   : > { %s444_s7 = sshll.u32 %s437_s4, 4  ;;  %s1840_s19 = scalar_lea.hbm %s2236_s11, 128  ;;  %s445_s7 = int_to_ptr.vmem [resolvable:$true] %s444_s7 }
  0x95   : > { %p1841_p1 = scmp.ne.s32.totalorder %s2236_s11, %s1840_s19  ;;  %s1845_s2 = scalar_lea.hbm %s2479_s1, 256 }
  0x96   : > { %p1846_p3 = scmp.lt.u32.totalorder %s2236_s11, %s2479_s1  ;;  %p1847_p5 = scmp.lt.u32.totalorder %s1845_s2, %s1840_s19 }
  0x97   : > { %p1843_p13 = pnand %p1841_p1, %p1812_p12  ;;  %p1849_p9 = scmp.lt.u32.totalorder %s1840_s19, %s2236_s11 }
  0x98   : > { %p1848_p11 = por %p1847_p5, %p1846_p3 }
  0x99   : > { %p1844_p6 = pneg %p1843_p13 }
  0x9a   : > { %p1850_p0 = por %p1849_p9, %p1848_p11 }
  0x9c   : > { %p1851_p2 = pnand %p1850_p0, %p1844_p6 }
  0x9e   : > { %1854 = shalt.err (!%p1851_p2)
}
  0x9f   : > { %s1855_s20 = scalar_lea.vmem %s445_s7, 128  ;;  %s1972_s17 = smov [#allocation5]  }
  0xa0   : > { %p1856_p4 = scmp.ne.s32.totalorder %s445_s7, %s1855_s20  ;;  %s1860_s12 = sshll.u32 %s1972_s17, 4  ;;  %s1861_s12 = int_to_ptr.vmem [resolvable:$false] %s1860_s12 }
  0xa1   : > { %s1862_s24 = scalar_lea.vmem %s1861_s12, 256  ;;  %p1863_p13 = scmp.lt.s32.totalorder %s445_s7, %s1861_s12 }
  0xa2   : > { %p1858_p8 = pnand %p1856_p4, %p1812_p12  ;;  %p1864_p10 = scmp.lt.s32.totalorder %s1862_s24, %s1855_s20 }
  0xa4   : > { %p1859_p1 = pneg %p1858_p8  ;;  %p1865_p3 = por %p1864_p10, %p1863_p13 }
  0xa6   : > { %p1866_p5 = pnand %p1865_p3, %p1859_p1 }
  0xa8   : > { %1869 = shalt.err (!%p1866_p5)
}
  0xa9   : > { %1626 = dma.hbm_to_vmem [thread:$0]  (!%p2229_p7), %s2236_s11, 128, %s445_s7, %s434_s14  }
  0xaa   : > { %p2520_p6 = scmp.ne.s32.totalorder %s2511_s13, 0 }
  0xab   : > { %s2289_s28 = sand.u32 (!%p2520_p6), 1, %s1948_s22   ;;  %p2521_p10 = scmp.ne.s32.totalorder (!%p2520_p6), %s2508_s29, 0 }
  0xac   : > { %453 = sbr.rel (%p2520_p6) target bundleno = 1958 (0x7a6), region = 68  ;;  %s2292_s4 = sshll.u32 (!%p2520_p6), %s2289_s28, 3 }
  0xad   : > { %s456_s19 = scalar_lea.sflag (!%p2520_p6), [#allocation3], %s2289_s28  ;;  %s459_s18 = scalar_lea.vmem (!%p2520_p6), [#allocation2], %s2292_s4 }
  0xb3   : > { %1923 = dma.done.wait (%p2521_p10), %s456_s19, 128  }
  0xb4   : > { %1925 = vsyncadd (%p2521_p10), %s456_s19, 4294967168  ;;  %s464_s13 = sand.u32 1, %s2078_s27   ;;  %s468_s11 = scalar_lea.vmem [#allocation5], %s2292_s4 }
  0xb5   : > { %s465_s15 = scalar_lea.sflag [#allocation6], %s464_s13 }
  0xb6   : > { %1927 = dma.done.wait (%p2521_p10), %s465_s15, 128  }
  0xb7   : > { %1929 = vsyncadd (%p2521_p10), %s465_s15, 4294967168  ;;  %p2522_p7 = scmp.eq.s32.totalorder %s2078_s27, 0 }
  0xb9   : > { %1931 = dma.done.wait (%p2522_p7), [#allocation6], 256   ;;  %p2523_p12 = pmov %p2522_p7 }
  0xba   : > { %p2524_p11 = pmov %p2522_p7 }
  0xbb   : > { %1933 = vsyncadd (%p2523_p12), [#allocation6], 4294967040 }
  0xbc   : > { %1935 = dma.done.wait (%p2524_p11), [#allocation9], 512   ;;  %p2525_p9 = pmov %p2522_p7 }
  0xbd   : > { %v1973_v0 = vmov 0.0   ;;  %vm1974_vm0 = vmmov 0   ;;  %v1700_v1 = vld [vmem:[#allocation8] sm:$0xff]   ;;  %v1701_v2 = vld [vmem:[#allocation7] sm:$0xff]   ;;  %v1702_v3 = vld [vmem:[#allocation8 + $0x8] sm:$0xff]   ;;  %vm554_vm1 = vcmask 261120  }
  0xbe   : > { %1937 = vsyncadd (%p2525_p9), [#allocation9], 4294966784  ;;  %1520 = vmatprep.subr.bf16.mxu1 %v1973_v0  ;;  %1512 = vmatprep.subr.bf16.mxu0 %v1973_v0  ;;  %v528_v4 = vld [vmem:[%s468_s11] sm:$0xff]  ;;  %v1703_v5 = vld [vmem:[#allocation7 + $0x8] sm:$0xff]   ;;  %vm730_vm2 = vcmask 64512   ;;  %s1975_s10 = smov 112  }
  0xbf   : > { %1524 = vmatprep.mubr.msk.bf16.mxu1 %vm1974_vm0, %v1973_v0  ;;  %1516 = vmatprep.mubr.msk.bf16.mxu0 %vm1974_vm0, %v1973_v0  ;;  %v2322_v6 = vld [vmem:[%s459_s18] sm:$0xff]  ;;  %v530_v7 = vpack.c.bf16 %v528_v4, %v528_v4  ;;  %s1976_s2 = smov 120   ;;  %s1977_s21 = smov 104   ;;  %vm793_vm3 = vcmask 1043456   ;;  %vm1186_vm4 = vcmask 130048   ;;  %vm1188_vm5 = vcmask 195584  }
  0xc0   : > { %1521 = vmatpush3.bf16.msra.mxu1 %v1700_v1  ;;  %1513 = vmatpush3.bf16.msra.mxu0 %v1701_v2  ;;  %v529_v8 = vpack.c.bf16 %v2322_v6, %v2322_v6  ;;  %v1458_v9 = vld [vmem:[%s2483_s5] ss:$0 sm:$0xff]  ;;  %v1705_v25 = vld [vmem:[%s2484_s6 + $0x8] sm:$0xff]   ;;  %s2526_s18 = sld [smem:[#allocation22_spill]]  ;;  %s1978_s13 = smov 8  }
  0xc1   : > { %1522 = vmatprep.subr.bf16.mxu1 %v1973_v0  ;;  %1514 = vmatprep.subr.bf16.mxu0 %v1973_v0  ;;  %v1454_v10 = vld [vmem:[%s2481_s3] ss:$0 sm:$0xff]  ;;  %s1979_s15 = smov 16   ;;  %s1980_s11 = smov 24  }
  0xc2   : > { %v1704_v24 = vld [vmem:[%s2484_s6] sm:$0xff]   ;;  %s2527_s7 = sld [smem:[#allocation24_spill]]  ;;  %s2528_s14 = sld [smem:[#allocation18_spill]] }
  0xc3   : > { %s2530_s17 = sld [smem:[#allocation26_spill]]  ;;  %s525_s24 = scalar_lea.vmem [#allocation11], %s2292_s4 }
  0xc4   : > { %1523 = vmatpush3.bf16.msra.mxu1 %v1702_v3  ;;  %1515 = vmatpush3.bf16.msra.mxu0 %v1703_v5  ;;  %s1305_s19 = sshll.u32 %s525_s24, 4  ;;  %s1291_s27 = scalar_lea.sflag [#allocation4], %s2289_s28  ;;  %s2430_s19 = int_to_ptr.vmem [resolvable:$true] %s1305_s19 }
  0xc5   : > { %1536 = vmatprep.subr.bf16.mxu1 %v1973_v0  ;;  %1528 = vmatprep.subr.bf16.mxu0 %v1973_v0  ;;  %s1870_s29 = scalar_lea.vmem %s2430_s19, 128  ;;  %p2532_p2 = scmp.ne.s32.totalorder %s2518_s9, 0 }
  0xc6   : > { %v1462_v41 = vld [vmem:[%s2526_s18] ss:$0 sm:$0xff]  ;;  %p1871_p0 = scmp.ne.s32.totalorder %s2430_s19, %s1870_s29  ;;  %s1981_s4 = smov [#allocation11]  }
  0xc7   : > { %1525 = vmatmul.mubr.msk.bf16.vlgmr.msra.gmra.mrb[0].mxu1 %vm554_vm1, %v530_v7  ;;  %1517 = vmatmul.mubr.msk.bf16.vlgmr.msra.gmra.mrb[0].mxu0 %vm554_vm1, %v529_v8 }
  0xc8   : > { %1538 = vmatprep.mubr.msk.bf16.mxu1 %vm1974_vm0, %v1973_v0  ;;  %1532 = vmatprep.mubr.msk.bf16.mxu0 %vm1974_vm0, %v1973_v0  ;;  %s1481_s12 = sshll.u32 %s2528_s14, 7  ;;  %p1872_p4 = pnand %p1871_p0, %p2532_p2 }
  0xc9   : > { %1529 = vmatpush3.bf16.msra.mxu0 %v1704_v24 }
  0xca   : > { %1530 = vmatprep.subr.bf16.mxu0 %v1973_v0  ;;  %p1873_p8 = pneg %p1872_p4 }
  0xcd   : > { %1531 = vmatpush3.bf16.msra.mxu0 %v1705_v25 }
  0xce   : > { %1542 = vmatprep.subr.bf16.mxu0 %v1973_v0 }
  0xd0   : > { %1533 = vmatmul.mubr.msk.bf16.vlgmr.msra.gmra.mrb[4].mxu0 %vm554_vm1, %v530_v7 }
  0xd1   : > { %1544 = vmatprep.mubr.msk.bf16.mxu0 %vm1974_vm0, %v1973_v0 }
 0x19a   : > { %v658_v11 = vpop.f32.mrb[0].mxu1  ;;  %v592_v14 = vpop.f32.mrb[0].mxu0 }
 0x19b   : > { %v659_v12 = vadd.f32 %v1458_v9, %v658_v11  ;;  %v1526_v13 = vpop.f32.mrb[1].mxu1  ;;  %v593_v16 = vadd.f32 %v1454_v10, %v592_v14  ;;  %v1518_v17 = vpop.f32.mrb[1].mxu0 }
 0x19c   : > { %v661_v15 = vpop.f32.mrb[2].mxu1  ;;  %v595_v20 = vpop.f32.mrb[2].mxu0 }
 0x19d   : > { %v728_v18 = vpack.c.bf16 %v659_v12, %v659_v12  ;;  %v1527_v19 = vpop.f32.mrb[3].mxu1  ;;  %v1519_v21 = vpop.f32.mrb[3].mxu0  ;;  %v727_v22 = vpack.c.bf16 %v593_v16, %v593_v16 }
 0x19f   : > { %953 = vrot.lane.b32.xlu1 %v728_v18, %s1975_s10  ;;  %841 = vrot.lane.b32.xlu0 %v728_v18, %s1976_s2  ;;  %v735_v23 = vsel %vm730_vm2, %v728_v18, 0 }
 0x1a0   : > { %1537 = vmatpush3.bf16.xpose.msra.mxu1 %v735_v23 }
 0x1a1   : > { %1548 = vmatprep.subr.bf16.mxu1 %v1973_v0 }
 0x1a3   : > { %951 = vrot.lane.b32.xlu1 %v727_v22, %s1975_s10  ;;  %838 = vrot.lane.b32.xlu0 %v727_v22, %s1976_s2  ;;  %v721_v42 = vpop.f32.mrb[4].mxu0 }
 0x1a4   : > { %v722_v43 = vadd.f32 %v1462_v41, %v721_v42  ;;  %v1534_v44 = vpop.f32.mrb[5].mxu0 }
 0x1a5   : > { %v724_v45 = vpop.f32.mrb[6].mxu0 }
 0x1a6   : > { %v729_v46 = vpack.c.bf16 %v722_v43, %v722_v43  ;;  %v1535_v47 = vpop.f32.mrb[7].mxu0 }
 0x1a7   : > { %1062 = vrot.lane.b32.xlu1 %v727_v22, %s1977_s21  ;;  %1064 = vrot.lane.b32.xlu0 %v728_v18, %s1977_s21 }
 0x1a8   : > { %1539 = vmatmul.mubr.msk.bf16.vlgmr.msra.gmra.mrb[4].mxu1 %vm730_vm2, %v727_v22  ;;  %v795_v48 = vsel %vm793_vm3, %v729_v46, 0 }
 0x1a9   : > { %1550 = vmatprep.mubr.msk.bf16.mxu1 %vm1974_vm0, %v1973_v0  ;;  %1543 = vmatpush3.bf16.msra.mxu0 %v795_v48 }
 0x1aa   : > { %1554 = vmatprep.subr.bf16.mxu0 %v1973_v0 }
 0x211   : > { %v842_v26 = vpop.permute.xlu0 %841  ;;  %v954_v28 = vpop.permute.xlu1 %953 }
 0x212   : > { %v847_v27 = vsel %vm730_vm2, %v842_v26, 0  ;;  %v959_v30 = vsel %vm730_vm2, %v954_v28, 0 }
 0x213   : > { %1549 = vmatpush3.bf16.xpose.msra.mxu1 %v847_v27 }
 0x214   : > { %1560 = vmatprep.subr.bf16.mxu1 %v1973_v0 }
 0x215   : > { %v839_v29 = vpop.permute.xlu0 %838  ;;  %v952_v32 = vpop.permute.xlu1 %951 }
 0x219   : > { %v1065_v31 = vpop.permute.xlu0 %1064  ;;  %v1063_v34 = vpop.permute.xlu1 %1062 }
 0x21a   : > { %1551 = vmatmul.mubr.msk.bf16.vlgmr.msra.gmra.mrb[8].mxu1 %vm730_vm2, %v839_v29  ;;  %v1070_v33 = vsel %vm730_vm2, %v1065_v31, 0 }
 0x21b   : > { %1561 = vmatpush3.bf16.xpose.msra.mxu1 %v959_v30  ;;  %1562 = vmatprep.mubr.msk.bf16.mxu1 %vm1974_vm0, %v1973_v0 }
 0x21c   : > { %1572 = vmatprep.subr.bf16.mxu1 %v1973_v0 }
 0x222   : > { %1563 = vmatmul.mubr.msk.bf16.vlgmr.msra.gmra.mrb[12].mxu1 %vm730_vm2, %v952_v32 }
 0x223   : > { %1573 = vmatpush3.bf16.xpose.msra.mxu1 %v1070_v33  ;;  %1574 = vmatprep.mubr.msk.bf16.mxu1 %vm1974_vm0, %v1973_v0 }
 0x224   : > { %1584 = vmatprep.subr.bf16.mxu1 %v1973_v0 }
 0x22a   : > { %1575 = vmatmul.mubr.msk.bf16.vlgmr.msra.gmra.mrb[16].mxu1 %vm730_vm2, %v1063_v34 }
 0x22b   : > { %1588 = vmatprep.mubr.msk.bf16.mxu1 %vm1974_vm0, %v1973_v0 }
 0x27b   : > { %v771_v35 = vpop.f32.mrb[4].mxu1 }
 0x27c   : > { %v777_v36 = vmul.f32 0.35355338, %v771_v35  ;;  %v1540_v37 = vpop.f32.mrb[5].mxu1 }
 0x27d   : > { %v774_v38 = vpop.f32.mrb[6].mxu1 }
 0x27e   : > { %v1541_v39 = vpop.f32.mrb[7].mxu1  ;;  %v778_v40 = vsel %vm730_vm2, %v777_v36, -inf }
 0x27f   : > { %779 = vmax.xlane.f32.xlu0 %v778_v40 }
 0x2ed   : > { %v883_v49 = vpop.f32.mrb[8].mxu1 }
 0x2ee   : > { %v889_v50 = vmul.f32 0.35355338, %v883_v49  ;;  %v1552_v51 = vpop.f32.mrb[9].mxu1 }
 0x2ef   : > { %v886_v52 = vpop.f32.mrb[10].mxu1  ;;  %v1706_v51 = vld [vmem:[#allocation10] sm:$0xff]  }
 0x2f0   : > { %v1553_v53 = vpop.f32.mrb[11].mxu1  ;;  %v890_v54 = vsel %vm730_vm2, %v889_v50, -inf  ;;  %1585 = vmatpush3.bf16.msra.mxu1 %v1706_v51 }
 0x2f1   : > { %891 = vmax.xlane.f32.xlu1 %v890_v54  ;;  %1586 = vmatprep.subr.bf16.mxu1 %v1973_v0 }
 0x2f5   : > { %v995_v55 = vpop.f32.mrb[12].mxu1 }
 0x2f6   : > { %v1001_v56 = vmul.f32 0.35355338, %v995_v55  ;;  %v1564_v57 = vpop.f32.mrb[13].mxu1 }
 0x2f7   : > { %v998_v58 = vpop.f32.mrb[14].mxu1 }
 0x2f8   : > { %v1565_v59 = vpop.f32.mrb[15].mxu1  ;;  %v1002_v60 = vsel %vm730_vm2, %v1001_v56, -inf }
 0x2f9   : > { %1003 = vmax.xlane.f32.xlu0 %v1002_v60 }
 0x2fd   : > { %v1106_v61 = vpop.f32.mrb[16].mxu1 }
 0x2fe   : > { %v1112_v62 = vmul.f32 0.35355338, %v1106_v61  ;;  %v1576_v63 = vpop.f32.mrb[17].mxu1 }
 0x2ff   : > { %v1109_v1 = vpop.f32.mrb[18].mxu1 }
 0x300   : > { %v1577_v2 = vpop.f32.mrb[19].mxu1  ;;  %v1113_v3 = vsel %vm730_vm2, %v1112_v62, -inf }
 0x301   : > { %1114 = vmax.xlane.f32.xlu0 %v1113_v3 }
 0x30c   : > { %v780_v4 = vpop.xlane.xlu0 %779 }
 0x30d   : > { %v781_v5 = vsub.f32 %v777_v36, %v780_v4 }
 0x30f   : > { %v782_v7 = vmul.f32 1.442695, %v781_v5 }
 0x311   : > { %1708 = vpow2.f32 %v782_v7 }
 0x31b   : > { %v1709_v8 = vpop.eup %1708 }
 0x31c   : > { %v784_v9 = vsel %vm730_vm2, %v1709_v8, 0.0 }
 0x31d   : > { %785 = vadd.xlane.f32.xlu1 %v784_v9 }
 0x32e   : > { %903 = vrot.lane.b32.xlu1 %v729_v46, %s1976_s2 }
 0x37e   : > { %v892_v10 = vpop.xlane.xlu1 %891 }
 0x37f   : > { %v893_v11 = vsub.f32 %v889_v50, %v892_v10  ;;  %v1477_v10 = vld [vmem:[%s2527_s7] ss:$0 sm:$0xff]  ;;  %s1874_s7 = sshll.u32 %s1981_s4, 4  ;;  %s1875_s7 = int_to_ptr.vmem [resolvable:$false] %s1874_s7 }
 0x380   : > { %s1876_s14 = scalar_lea.vmem %s1875_s7, 256  ;;  %p1877_p1 = scmp.lt.s32.totalorder %s2430_s19, %s1875_s7 }
 0x381   : > { %v894_v12 = vmul.f32 1.442695, %v893_v11  ;;  %p1878_p13 = scmp.lt.s32.totalorder %s1876_s14, %s1870_s29 }
 0x383   : > { %1710 = vpow2.f32 %v894_v12  ;;  %p1879_p3 = por %p1878_p13, %p1877_p1 }
 0x385   : > { %p1880_p5 = pnand %p1879_p3, %p1873_p8 }
 0x386   : > { %v1004_v13 = vpop.xlane.xlu0 %1003 }
 0x387   : > { %v1005_v14 = vsub.f32 %v1001_v56, %v1004_v13  ;;  %v1707_v56 = vld [vmem:[#allocation10 + $0x8] sm:$0xff]  }
 0x388   : > { %1587 = vmatpush3.bf16.msra.mxu1 %v1707_v56 }
 0x389   : > { %v1006_v15 = vmul.f32 1.442695, %v1005_v14 }
 0x38b   : > { %1712 = vpow2.f32 %v1006_v15 }
 0x38d   : > { %v1711_v16 = vpop.eup %1710 }
 0x38e   : > { %v1115_v17 = vpop.xlane.xlu0 %1114  ;;  %v896_v18 = vsel %vm730_vm2, %v1711_v16, 0.0 }
 0x38f   : > { %v1116_v19 = vsub.f32 %v1112_v62, %v1115_v17  ;;  %897 = vadd.xlane.f32.xlu0 %v896_v18 }
 0x391   : > { %v1117_v20 = vmul.f32 1.442695, %v1116_v19 }
 0x393   : > { %1714 = vpow2.f32 %v1117_v20 }
 0x395   : > { %v1713_v21 = vpop.eup %1712 }
 0x396   : > { %v1008_v22 = vsel %vm730_vm2, %v1713_v21, 0.0 }
 0x397   : > { %1009 = vadd.xlane.f32.xlu1 %v1008_v22 }
 0x39d   : > { %v1715_v23 = vpop.eup %1714 }
 0x39e   : > { %v1119_v24 = vsel %vm730_vm2, %v1715_v23, 0.0 }
 0x39f   : > { %1120 = vadd.xlane.f32.xlu0 %v1119_v24 }
 0x3a8   : > { %1125 = vrot.lane.b32.xlu1 %v729_v46, %s1977_s21  ;;  %s2529_s21 = sld [smem:[#allocation25_spill]] }
 0x3aa   : > { %v786_v25 = vpop.xlane.xlu1 %785 }
 0x3ab   : > { %1716 = vrcp.f32 %v786_v25 }
 0x3ae   : > { %v904_v27 = vpop.permute.xlu1 %903  ;;  %v1478_v25 = vld [vmem:[%s2529_s21] ss:$0 sm:$0xff] }
 0x3af   : > { %v909_v30 = vsel %vm793_vm3, %v904_v27, 0  ;;  %v1479_v27 = vld [vmem:[%s2530_s17] ss:$0 sm:$0xff] }
 0x3b5   : > { %v1717_v26 = vpop.eup %1716  ;;  %1014 = vrot.lane.b32.xlu0 %v729_v46, %s1975_s10 }
 0x3b6   : > { %v788_v28 = vmul.f32 %v1717_v26, %v1709_v8 }
 0x3b8   : > { %v789_v29 = vpack.c.bf16 %v788_v28, %v788_v28 }
 0x3ba   : > { %1545 = vmatmul.mubr.msk.bf16.vlgmr.msra.gmra.mrb[8].mxu0 %vm730_vm2, %v789_v29 }
 0x3bb   : > { %1555 = vmatpush3.bf16.msra.mxu0 %v909_v30  ;;  %1556 = vmatprep.mubr.msk.bf16.mxu0 %vm1974_vm0, %v1973_v0 }
 0x3bc   : > { %1566 = vmatprep.subr.bf16.mxu0 %v1973_v0 }
 0x41c   : > { %v898_v31 = vpop.xlane.xlu0 %897 }
 0x41d   : > { %1718 = vrcp.f32 %v898_v31 }
 0x424   : > { %v1010_v32 = vpop.xlane.xlu1 %1009 }
 0x425   : > { %1720 = vrcp.f32 %v1010_v32 }
 0x427   : > { %v1719_v33 = vpop.eup %1718 }
 0x428   : > { %v900_v34 = vmul.f32 %v1719_v33, %v1711_v16  ;;  %v1126_v41 = vpop.permute.xlu1 %1125 }
 0x429   : > { %v1131_v43 = vsel %vm793_vm3, %v1126_v41, 0 }
 0x42a   : > { %v901_v35 = vpack.c.bf16 %v900_v34, %v900_v34 }
 0x42c   : > { %v1121_v36 = vpop.xlane.xlu0 %1120  ;;  %1557 = vmatmul.mubr.msk.bf16.vlgmr.msra.gmra.mrb[12].mxu0 %vm730_vm2, %v901_v35 }
 0x42d   : > { %1722 = vrcp.f32 %v1121_v36  ;;  %1568 = vmatprep.mubr.msk.bf16.mxu0 %vm1974_vm0, %v1973_v0 }
 0x42f   : > { %v1721_v37 = vpop.eup %1720 }
 0x430   : > { %v1012_v38 = vmul.f32 %v1721_v37, %v1713_v21  ;;  %v1015_v39 = vpop.permute.xlu0 %1014 }
 0x431   : > { %v1020_v40 = vsel %vm793_vm3, %v1015_v39, 0 }
 0x432   : > { %1567 = vmatpush3.bf16.msra.mxu0 %v1020_v40  ;;  %v1013_v42 = vpack.c.bf16 %v1012_v38, %v1012_v38 }
 0x433   : > { %1578 = vmatprep.subr.bf16.mxu0 %v1973_v0 }
 0x435   : > { %1569 = vmatmul.mubr.msk.bf16.vlgmr.msra.gmra.mrb[16].mxu0 %vm730_vm2, %v1013_v42 }
 0x436   : > { %1579 = vmatpush3.bf16.msra.mxu0 %v1131_v43  ;;  %1580 = vmatprep.mubr.msk.bf16.mxu0 %vm1974_vm0, %v1973_v0 }
 0x437   : > { %v1723_v44 = vpop.eup %1722 }
 0x438   : > { %v1123_v45 = vmul.f32 %v1723_v44, %v1715_v23 }
 0x43a   : > { %v1124_v46 = vpack.c.bf16 %v1123_v45, %v1123_v45 }
 0x43d   : > { %1581 = vmatmul.mubr.msk.bf16.vlgmr.msra.gmra.mrb[20].mxu0 %vm730_vm2, %v1124_v46 }
 0x48d   : > { %v831_v47 = vpop.f32.mrb[8].mxu0 }
 0x48e   : > { %v1546_v48 = vpop.f32.mrb[9].mxu0 }
 0x48f   : > { %v834_v49 = vpop.f32.mrb[10].mxu0 }
 0x490   : > { %v1547_v50 = vpop.f32.mrb[11].mxu0 }
 0x4ff   : > { %v945_v52 = vpop.f32.mrb[12].mxu0 }
 0x500   : > { %1174 = vrot.lane.b32.xlu1 %v945_v52, %s1978_s13  ;;  %v1558_v53 = vpop.f32.mrb[13].mxu0 }
 0x501   : > { %v948_v54 = vpop.f32.mrb[14].mxu0 }
 0x502   : > { %v1559_v55 = vpop.f32.mrb[15].mxu0 }
 0x508   : > { %v1056_v57 = vpop.f32.mrb[16].mxu0 }
 0x509   : > { %1178 = vrot.lane.b32.xlu0 %v1056_v57, %s1979_s15  ;;  %v1570_v58 = vpop.f32.mrb[17].mxu0  ;;  %s2531_s15 = sld [smem:[#allocation27_spill]] }
 0x50a   : > { %v1059_v59 = vpop.f32.mrb[18].mxu0 }
 0x50b   : > { %v1571_v60 = vpop.f32.mrb[19].mxu0 }
 0x510   : > { %v1167_v61 = vpop.f32.mrb[20].mxu0 }
 0x511   : > { %1182 = vrot.lane.b32.xlu1 %v1167_v61, %s1980_s11  ;;  %v1582_v62 = vpop.f32.mrb[21].mxu0  ;;  %s2428_s11 = scalar_lea.hbm %s2531_s15, %s1481_s12 }
 0x512   : > { %v1170_v63 = vpop.f32.mrb[22].mxu0 }
 0x513   : > { %v1583_v1 = vpop.f32.mrb[23].mxu0 }
 0x572   : > { %v1175_v0 = vpop.permute.xlu1 %1174 }
 0x573   : > { %v1185_v3 = vsel %vm730_vm2, %v831_v47, %v1175_v0 }
 0x57b   : > { %v1179_v2 = vpop.permute.xlu0 %1178 }
 0x57c   : > { %v1187_v4 = vsel %vm1186_vm4, %v1185_v3, %v1179_v2 }
 0x583   : > { %v1183_v5 = vpop.permute.xlu1 %1182 }
 0x584   : > { %v1189_v7 = vsel %vm1188_vm5, %v1187_v4, %v1183_v5 }
 0x585   : > { %v1190_v8 = vpack.c.bf16 %v1189_v7, %v1189_v7 }
 0x587   : > { %1589 = vmatmul.mubr.msk.bf16.vlgmr.msra.gmra.mrb[20].mxu1 %vm554_vm1, %v1190_v8 }
 0x65a   : > { %v1244_v9 = vpop.f32.mrb[20].mxu1 }
 0x65b   : > { %v1250_v11 = vadd.f32 %v1244_v9, %v2322_v6  ;;  %v1590_v12 = vpop.f32.mrb[21].mxu1 }
 0x65c   : > { %v1247_v13 = vpop.f32.mrb[22].mxu1 }
 0x65d   : > { %v1591_v14 = vpop.f32.mrb[23].mxu1  ;;  %v1258_v15 = vadd.f32 %v1477_v10, %v1250_v11 }
 0x65f   : > { %v1259_v16 = vsel %vm554_vm1, %v1258_v15, 0.0 }
 0x660   : > { %1260 = vadd.xlane.f32.xlu0 %v1259_v16 }
 0x6ed   : > { %v1261_v17 = vpop.xlane.xlu0 %1260 }
 0x6ee   : > { %v1263_v18 = vmul.f32 0.03125, %v1261_v17 }
 0x6f0   : > { %v1264_v19 = vsub.f32 %v1258_v15, %v1263_v18 }
 0x6f2   : > { %v1265_v20 = vmul.f32 %v1264_v19, %v1264_v19 }
 0x6f4   : > { %v1266_v21 = vsel %vm554_vm1, %v1265_v20, 0.0 }
 0x6f5   : > { %1267 = vadd.xlane.f32.xlu1 %v1266_v21 }
 0x782   : > { %v1268_v22 = vpop.xlane.xlu1 %1267 }
 0x783   : > { %v1269_v23 = vmul.f32 0.03125, %v1268_v22 }
 0x785   : > { %v1270_v6 = vadd.f32 1e-05, %v1269_v23 }
 0x787   : > { %1724 = vrsqrt.f32 %v1270_v6 }
 0x791   : > { %v1725_v24 = vpop.eup %1724 }
 0x792   : > { %v1272_v26 = vmul.f32 %v1725_v24, %v1264_v19 }
 0x794   : > { %v1280_v28 = vmul.f32 %v1478_v25, %v1272_v26 }
 0x796   : > { %v1288_v29 = vadd.f32 %v1479_v27, %v1280_v28 }
 0x798   : > { %1289 = vst.msk [vmem:[%s525_s24] sm:$0xff] %vm554_vm1, %v1288_v29 }
 0x799   : > { %1883 = shalt.err (!%p1880_p5)
}
 0x79a   : > { %s1884_s28 = scalar_lea.hbm %s2428_s11, 128  ;;  %s1888_s21 = scalar_lea.hbm %s2531_s15, 256 }
 0x79b   : > { %p1885_p6 = scmp.ne.s32.totalorder %s2428_s11, %s1884_s28  ;;  %p1889_p12 = scmp.lt.u32.totalorder %s2428_s11, %s2531_s15 }
 0x79c   : > { %p1890_p11 = scmp.lt.u32.totalorder %s1888_s21, %s1884_s28  ;;  %p1892_p0 = scmp.lt.u32.totalorder %s1884_s28, %s2428_s11 }
 0x79d   : > { %p1886_p10 = pnand %p1885_p6, %p2532_p2 }
 0x79e   : > { %p1891_p9 = por %p1890_p11, %p1889_p12 }
 0x79f   : > { %p1887_p7 = pneg %p1886_p10 }
 0x7a0   : > { %p1893_p4 = por %p1892_p0, %p1891_p9 }
 0x7a2   : > { %p1894_p8 = pnand %p1893_p4, %p1887_p7 }
 0x7a4   : > { %1897 = shalt.err (!%p1894_p8)
}
 0x7a5   : > { %1608 = dma.vmem_to_hbm [thread:$0]  (%p2532_p2), %s2430_s19, 128, %s2428_s11, %s1291_s27  }
 0x7a6 PF: > { %s2533_s17 = sld [smem:[#allocation17_spill]]  ;;  %s2534_s12 = sld [smem:[#allocation19_spill]] }
 0x7a7   : > { %p2536_p13 = scmp.ge.s32.totalorder %s1964_s26, 2 }
 0x7ac   : > { %s1317_s24 = sand.u32 1, %s2533_s17   ;;  %p2535_p1 = scmp.ne.s32.totalorder %s2534_s12, 0 }
 0x7ad   : > { %s1318_s18 = scalar_lea.sflag [#allocation4], %s1317_s24 }
 0x7ae   : > { %p1628_p3 = pnand %p2536_p13, %p2535_p1 }
 0x7b0   : > { %1939 = dma.done.wait (!%p1628_p3), %s1318_s18, 128  }
 0x7b1   : > { %1941 = vsyncadd (!%p1628_p3), %s1318_s18, 4294967168  ;;  %s32_s26 = sadd.s32 1, %s1964_s26   ;;  %s2537_s21 = smov %s1948_s22 }
 0x7b2   : > { %p29_p5 = scmp.ge.s32.totalorder %s32_s26, 4   ;;  %s2538_s22 = smov %s1952_s23 }
 0x7b3   : > { %s2539_s23 = smov %s2217_s30  ;;  %s2540_s24 = smov %s1960_s25 }
 0x7b4   : > { %s2541_s25 = smov %s2543_s16  ;;  %31 = sbr.rel (!%p29_p5) target bundleno = 18 (0x12), region = 138 }
 0x7bb   :  { %1323 = vsyncpa [#allocation3], 1 }
 0x7bc   :  { %1325 = vsyncpa [#allocation3 + $0x1], 1 }
 0x7bd   :  { %1326 = vsyncpa [#allocation6], 1 }
 0x7be   :  { %1328 = vsyncpa [#allocation6 + $0x1], 1 }
 0x7bf   :  { %1329 = vsyncpa [#allocation9], 1 }
 0x7c0   :  { %1330 = vsyncpa [#allocation4], 1 }
 0x7c1   :  { %1332 = vsyncpa [#allocation4 + $0x1], 1 }

</bundles_post_ra>
